<compile_context>
chip_gen: v5e
topology: v5e:2x2
jax: 0.10.0
libtpu: 0.0.40
codegen_flags: <defaults>
</compile_context>

<pallas_src>
import math
import functools
import numpy as np

import jax
import jax.numpy as jnp
from jax import lax
from jax.experimental import pallas as pl
from jax.experimental.pallas import tpu as pltpu


# --------------------------------------------------------------------------- layout helpers

def _im2col(feat, fH, fW):
    """feat (I,S,C,H,W) -> patches (I,S,K,N) with K=C*fH*fW (tap-major), N=H*W ('same' conv)."""
    I, S, C, H, W = feat.shape
    ph, pw = fH // 2, fW // 2
    fp = jnp.pad(feat, ((0, 0), (0, 0), (0, 0), (ph, ph), (pw, pw)))
    taps = [fp[:, :, :, dy:dy + H, dx:dx + W] for dy in range(fH) for dx in range(fW)]
    p = jnp.stack(taps, axis=2)                    # (I, S, fH*fW, C, H, W)
    return p.reshape(I, S, fH * fW * C, H * W)


def _weights_to_mat(weights):
    """(S, F, C, fH, fW) -> (S, F, K) with k = (dy*fW+dx)*C + c."""
    S, F, C, fH, fW = weights.shape
    return jnp.transpose(weights, (0, 1, 3, 4, 2)).reshape(S, F, fH * fW * C)


def _mat_to_weights(w_mat, C, fH, fW):
    """(S, F, K) -> (S, F, C, fH, fW)."""
    S, F, K = w_mat.shape
    return jnp.transpose(w_mat.reshape(S, F, fH, fW, C), (0, 1, 4, 2, 3))


# --------------------------------------------------------------------------- fused GN kernel

def _fused_gn_kernel(params_ref,      # SMEM (3,): [reg_weight, step_length_factor, sample_weight]
                     p_ref,           # (1, K, IN)     im2col patches (images folded into IN)
                     mlab_ref,        # (1, F_pad, IN) sample_weight * mask * label
                     msc_ref,         # (1, F_pad, IN) sample_weight * mask
                     w0_ref,          # (1, F_pad, K)  initial filter (tap-major, F padded)
                     eye_ref,         # (F_pad, F_pad) identity (MXU-based small transpose)
                     w_out_ref,       # (1, num_iter, F_pad, K)
                     loss_ref,        # (1, n_loss, 128) per-sequence residual sum-of-squares
                     *, num_iter, compute_losses, n_loss):
    reg = params_ref[0]
    step = params_ref[1]
    sw = params_ref[2]

    p = p_ref[0]                     # (K, IN)   -- VMEM resident across all iterations
    mlab = mlab_ref[0]               # (F_pad, IN)
    msc = msc_ref[0]                 # (F_pad, IN)
    eye_f = eye_ref[...]             # (F_pad, F_pad)
    w = w0_ref[0]                    # (F_pad, K)

    # Per-sequence Gram matrix of the patches, computed once and reused by every
    # iteration's alpha denominator (replaces the per-iteration scores_grad pass).
    gram = lax.dot_general(p, p, (((1,), (1,)), ((), ())),
                           preferred_element_type=jnp.float32)           # (K, K)

    def residual(w_cur):
        scores = jnp.dot(w_cur, p, preferred_element_type=jnp.float32)   # (F_pad, IN)
        return msc * scores - mlab            # == sample_weight * mask * (scores - label)

    loss_vals = []
    for it in range(num_iter):                # static unroll; num_iter is small
        res = residual(w)                                                # (F_pad, IN)
        if compute_losses:
            loss_vals.append(jnp.sum(res * res, keepdims=True))          # (1, 1)

        # Filter gradient, flipped so K rows feed the MXU:  gT = P @ res^T   (K, F_pad)
        gT = lax.dot_general(p, res, (((1,), (1,)), ((), ())),
                             preferred_element_type=jnp.float32)
        # Tiny (K,F)->(F,K) transpose as an MXU matmul: g = I_F @ gT^T.
        g = lax.dot_general(eye_f, gT, (((1,), (1,)), ((), ())),
                            preferred_element_type=jnp.float32)          # (F_pad, K)

        wg = sw * g + reg * w                                            # weights_grad
        alpha_num = jnp.sum(wg * wg, keepdims=True)                      # (1, 1)
        # sum_{i,f,y,x} (sw * conv(feat, wg))^2  ==  sw^2 * sum((wg @ G) * wg)
        wgG = jnp.dot(wg, gram, preferred_element_type=jnp.float32)      # (F_pad, K)
        sg_ssq = (sw * sw) * jnp.sum(wgG * wg, keepdims=True)            # (1, 1)
        alpha_den = jnp.maximum(sg_ssq + reg * alpha_num, 1e-8)
        alpha = alpha_num / alpha_den                                    # (1, 1)

        w = w - (step * alpha) * wg
        w_out_ref[0, it] = w

    if compute_losses:
        res = residual(w)
        loss_vals.append(jnp.sum(res * res, keepdims=True))

    # Lane-dense loss slab: row t of (n_loss, 128) carries iteration t's per-sequence SSQ.
    slab = jnp.zeros((n_loss, 128), jnp.float32)
    if compute_losses:
        row_id = lax.broadcasted_iota(jnp.int32, (n_loss, 128), 0)
        for t, v in enumerate(loss_vals):
            slab = slab + jnp.where(row_id == t, v, 0.0)
    loss_ref[0] = slab


def _fused_gn_call(patches_s, mlab_s, msc_s, w0, params, num_iter, compute_losses):
    """One pallas_call for the whole GN loop.  grid=(S,), everything VMEM resident per step."""
    S, K, IN = patches_s.shape
    F_pad = w0.shape[1]
    n_loss = (num_iter + 1) if compute_losses else 1
    eye_f = jnp.eye(F_pad, dtype=jnp.float32)
    kernel = functools.partial(_fused_gn_kernel, num_iter=num_iter,
                               compute_losses=compute_losses, n_loss=n_loss)
    return pl.pallas_call(
        kernel,
        out_shape=(jax.ShapeDtypeStruct((S, num_iter, F_pad, K), jnp.float32),
                   jax.ShapeDtypeStruct((S, n_loss, 128), jnp.float32)),
        grid_spec=pltpu.PrefetchScalarGridSpec(
            num_scalar_prefetch=0,
            grid=(S,),
            in_specs=[
                pl.BlockSpec(memory_space=pltpu.MemorySpace.SMEM),        # params (3,) scalars
                pl.BlockSpec((1, K, IN), lambda s: (s, 0, 0)),            # patches
                pl.BlockSpec((1, F_pad, IN), lambda s: (s, 0, 0)),        # sw*mask*label
                pl.BlockSpec((1, F_pad, IN), lambda s: (s, 0, 0)),        # sw*mask
                pl.BlockSpec((1, F_pad, K), lambda s: (s, 0, 0)),         # initial weights
                pl.BlockSpec((F_pad, F_pad), lambda s: (0, 0)),           # identity
            ],
            out_specs=[
                pl.BlockSpec((1, num_iter, F_pad, K), lambda s: (s, 0, 0, 0)),
                pl.BlockSpec((1, n_loss, 128), lambda s: (s, 0, 0)),
            ],
        ),
        compiler_params=pltpu.CompilerParams(
            dimension_semantics=("parallel",)),      # sequences shard across TensorCores (v7x)
    )(params, patches_s, mlab_s, msc_s, w0, eye_f)


# --------------------------------------------------------------------------- glue (plain JAX)

def generate_w2h2_label(bb, num_images, num_sequences, feat_stride, radius, output_sz, dim=4):
    """Faithful port of RegSteepestDescentGN.generate_w2h2_label (scatter stays in JAX)."""
    bb_t = bb.reshape(-1, 4).astype(jnp.float32)
    B = num_images * num_sequences
    fs = float(feat_stride)

    def trunc(x):  # torch .int().float(): truncation toward zero
        return x.astype(jnp.int32).astype(jnp.float32)

    center = trunc((bb_t[:, :2] + bb_t[:, 2:] / 2.0) / fs)                     # (B, 2)
    l = trunc(bb_t[:, 0] / fs)
    t = trunc(bb_t[:, 1] / fs)
    r = trunc((bb_t[:, 0] + bb_t[:, 2]) / fs)
    b = trunc((bb_t[:, 1] + bb_t[:, 3]) / fs)
    w2h2_center = jnp.stack((center[:, 0] - l, r - center[:, 0],
                             center[:, 1] - t, b - center[:, 1]), axis=1)       # (B, 4)
    width = output_sz[0]
    w2h2_label = jnp.zeros((B, width, width, dim), jnp.float32)
    label_mask = jnp.zeros_like(w2h2_label)
    batch_idx = jnp.arange(B)

    for r_w in range(-radius, radius + 1):
        for r_h in range(-radius, radius + 1):
            wl = w2h2_center[:, 0] + r_w
            wr = w2h2_center[:, 1] - r_w
            ht = w2h2_center[:, 2] + r_h
            hb = w2h2_center[:, 3] - r_h
            pos = jnp.stack((center[:, 0] + r_w, center[:, 1] + r_h), axis=1)
            # whole-batch skip conditions (the reference uses `.any()` then `continue`)
            valid = jnp.logical_not(
                jnp.any(wl <= 0.0) | jnp.any(wr <= 0.0) | jnp.any(ht <= 0.0) |
                jnp.any(hb <= 0.0) | jnp.any(pos < 0.0) | jnp.any(pos >= float(width)))
            w2h2_cur = jnp.stack((wl, wr, ht, hb), axis=1)
            px = jnp.clip(pos[:, 0].astype(jnp.int32), 0, width - 1)
            py = jnp.clip(pos[:, 1].astype(jnp.int32), 0, width - 1)
            new_label = w2h2_label.at[batch_idx, px, py, :].set(w2h2_cur)
            new_mask = label_mask.at[batch_idx, px, py, :].set(1.0)
            w2h2_label = jnp.where(valid, new_label, w2h2_label)
            label_mask = jnp.where(valid, new_mask, label_mask)

    w2h2_label = jnp.transpose(w2h2_label, (0, 3, 1, 2)).reshape(
        num_images, num_sequences, dim, width, width)
    label_mask = jnp.transpose(label_mask, (0, 3, 1, 2)).reshape(
        num_images, num_sequences, dim, width, width)
    return w2h2_label, label_mask


def reg_steepest_descent_gn(weights, feat, bb, *, num_iter=1, feat_stride=4, radius=0,
                            dim=4, init_step_length=1.0, init_filter_reg=0.01,
                            min_filter_reg=1e-3, compute_losses=True):
    """Forward pass of RegSteepestDescentGN (deterministic parameter init)."""
    I, S, C, H, W = feat.shape
    _, F, _, fH, fW = weights.shape
    assert fH % 2 == 1 and fW % 2 == 1, "odd filter sizes assumed ('same' conv)"
    assert dim == F
    assert num_iter >= 1
    output_sz = (H + (fH + 1) % 2, W + (fW + 1) % 2)

    # Parameters, initialized exactly like nn.Parameter in __init__ (runtime values -> SMEM)
    log_step_length = math.log(init_step_length) * jnp.ones((1,), jnp.float32)
    filter_reg = init_filter_reg * jnp.ones((1,), jnp.float32)
    step_length_factor = jnp.exp(log_step_length)                               # (1,)
    reg_weight = jnp.maximum(filter_reg * filter_reg, min_filter_reg ** 2)      # (1,)

    label, mask = generate_w2h2_label(bb, I, S, feat_stride, radius, output_sz, dim)
    sample_weight = math.sqrt(1.0 / I)
    # TODO(synk): tensor-valued sample_weight and detach_length (autograd detach) paths are not
    #             represented here; forward values are identical for the default path.

    K, N = C * fH * fW, H * W
    IN = I * N
    F_pad = ((F + 7) // 8) * 8                     # pad filter count to the sublane width

    # im2col once; fold images into the pixel axis -> per-sequence lane-dense (K, I*N).
    patches = _im2col(feat, fH, fW)                                     # (I, S, K, N)
    patches_s = jnp.transpose(patches, (1, 2, 0, 3)).reshape(S, K, IN)

    # Fold sample_weight into mask / label on the host:  residual = msc*scores - mlab.
    msc = (sample_weight * mask).reshape(I, S, F, N)
    mlab = msc * label.reshape(I, S, F, N)
    msc_s = jnp.transpose(msc, (1, 2, 0, 3)).reshape(S, F, IN)
    mlab_s = jnp.transpose(mlab, (1, 2, 0, 3)).reshape(S, F, IN)
    w_mat = _weights_to_mat(weights)                                    # (S, F, K)
    if F_pad != F:
        fpad = ((0, 0), (0, F_pad - F), (0, 0))
        msc_s = jnp.pad(msc_s, fpad)
        mlab_s = jnp.pad(mlab_s, fpad)
        w0 = jnp.pad(w_mat, fpad)
    else:
        w0 = w_mat

    params = jnp.concatenate([reg_weight.astype(jnp.float32),
                              step_length_factor.astype(jnp.float32),
                              jnp.array([sample_weight], jnp.float32)])          # (3,)

    w_iters, loss_slab = _fused_gn_call(patches_s, mlab_s, msc_s, w0, params,
                                        num_iter, compute_losses)

    w_mat_iterates = [w_mat] + [w_iters[:, t, :F, :] for t in range(num_iter)]
    weight_iterates = [_mat_to_weights(wm, C, fH, fW) for wm in w_mat_iterates]

    losses = []
    if compute_losses:
        denom = float(I * S * F * H * W)
        per_seq_ssq = loss_slab[:, :, 0]                                 # (S, num_iter+1)
        losses = [jnp.sum(per_seq_ssq[:, t]) / denom for t in range(num_iter + 1)]
    return weight_iterates[-1], weight_iterates, losses


# --------------------------------------------------------------------------- pure-JAX reference

def _reference_forward(weights, feat, bb, *, num_iter, feat_stride, radius, dim,
                       init_step_length=1.0, init_filter_reg=0.01, min_filter_reg=1e-3,
                       compute_losses=True):
    I, S, C, H, W = feat.shape
    _, F, _, fH, fW = weights.shape
    output_sz = (H + (fH + 1) % 2, W + (fW + 1) % 2)
    step = math.exp(math.log(init_step_length))
    reg = max(init_filter_reg ** 2, min_filter_reg ** 2)
    label, mask = generate_w2h2_label(bb, I, S, feat_stride, radius, output_sz, dim)
    sw = math.sqrt(1.0 / I)

    def conv(w):
        return jnp.stack(
            [lax.conv_general_dilated(feat[:, s], w[s], (1, 1), "SAME",
                                      dimension_numbers=("NCHW", "OIHW", "NCHW"),
                                      precision=lax.Precision.HIGHEST)
             for s in range(S)], axis=1)                                 # (I, S, F, H, W)

    ph, pw = fH // 2, fW // 2
    feat_pad = jnp.pad(feat, ((0, 0), (0, 0), (0, 0), (ph, ph), (pw, pw)))

    def conv_t(r):
        g = jnp.zeros((S, F, C, fH, fW), jnp.float32)
        for dy in range(fH):
            for dx in range(fW):
                g = g.at[:, :, :, dy, dx].set(
                    jnp.einsum("iscyx,isfyx->sfc",
                               feat_pad[:, :, :, dy:dy + H, dx:dx + W], r,
                               precision=lax.Precision.HIGHEST))
        return g

    w = weights
    iterates = [w]
    losses = []
    for _ in range(num_iter):
        scores = conv(w)
        res = sw * mask * (scores - label)
        if compute_losses:
            losses.append(jnp.mean(res ** 2))
        wg = conv_t(sw * res) + reg * w
        sg = sw * conv(wg)
        a_num = jnp.sum(wg.reshape(S, -1) ** 2, axis=1)
        a_den = jnp.maximum(jnp.sum(sg.reshape(I, S, -1) ** 2, axis=(0, 2)) + reg * a_num, 1e-8)
        alpha = a_num / a_den
        w = w - step * alpha.reshape(-1, 1, 1, 1, 1) * wg
        iterates.append(w)
    if compute_losses:
        scores = conv(w)
        losses.append(jnp.mean((sw * mask * (scores - label)) ** 2))
    return w, iterates, losses


# --------------------------------------------------------------------------- demo / checks

if __name__ == "__main__":
    key = jax.random.PRNGKey(0)
    I, S, C, H, W = 2, 2, 8, 16, 16      # images, sequences, feat_dim, spatial
    F, fH, fW = 4, 3, 3                  # num offset-map filters (dim=4), filter size
    k1, k2, k3 = jax.random.split(key, 3)

    feat = jax.random.normal(k1, (I, S, C, H, W), jnp.float32)
    weights = 0.1 * jax.random.normal(k2, (S, F, C, fH, fW), jnp.float32)
    bb_base = jnp.array([[12.0, 16.0, 24.0, 20.0],
                         [20.0, 12.0, 28.0, 24.0]], jnp.float32)         # (S, 4) (x, y, w, h)
    bb = bb_base[None, :, :] + 2.0 * jax.random.uniform(k3, (I, S, 4), jnp.float32)

    # Fused Pallas forward
    final_w, iterates, losses = reg_steepest_descent_gn(
        weights, feat, bb, num_iter=2, feat_stride=4, radius=0, dim=4)
    jax.block_until_ready(final_w)
    jax.block_until_ready(iterates[-1])
    jax.block_until_ready(losses[-1])

    # Pure-JAX reference of the full module forward
    ref_w, ref_iterates, ref_losses = _reference_forward(
        weights, feat, bb, num_iter=2, feat_stride=4, radius=0, dim=4)

    assert final_w.shape == weights.shape
    assert len(iterates) == 3 and len(losses) == 3
    np.testing.assert_allclose(np.asarray(final_w), np.asarray(ref_w),
                               rtol=5e-2, atol=5e-4)
    for wi, wr in zip(iterates, ref_iterates):
        np.testing.assert_allclose(np.asarray(wi), np.asarray(wr),
                                   rtol=5e-2, atol=5e-4)
    for li, lr in zip(losses, ref_losses):
        np.testing.assert_allclose(np.asarray(li), np.asarray(lr),
                                   rtol=5e-2, atol=1e-7)
    assert all(np.isfinite(np.asarray(l)) for l in losses)
    assert np.all(np.isfinite(np.asarray(final_w)))

    print("KERNEL_OK")
</pallas_src>

<mosaic_0001>
module attributes {stable_mosaic.version = 11 : i64} {
  func.func @_fused_gn_kernel(%arg0: i32, %arg1: memref<3xf32, #tpu.memory_space<smem>>, %arg2: memref<1x72x512xf32, #tpu.memory_space<vmem>>, %arg3: memref<1x8x512xf32, #tpu.memory_space<vmem>>, %arg4: memref<1x8x512xf32, #tpu.memory_space<vmem>>, %arg5: memref<1x8x72xf32, #tpu.memory_space<vmem>>, %arg6: memref<8x8xf32, #tpu.memory_space<vmem>>, %arg7: memref<1x2x8x72xf32, #tpu.memory_space<vmem>>, %arg8: memref<1x3x128xf32, #tpu.memory_space<vmem>>) attributes {dimension_semantics = [#tpu.dimension_semantics<parallel>], iteration_bounds = array<i64: 2>, scalar_prefetch = 0 : i64, scratch_operands = 0 : i64, tpu.core_type = #tpu.core_type<tc>, window_params = [{transform_indices = @transform_0, window_bounds = array<i64: 3>}, {transform_indices = @transform_1, window_bounds = array<i64: 1, 72, 512>}, {transform_indices = @transform_2, window_bounds = array<i64: 1, 8, 512>}, {transform_indices = @transform_3, window_bounds = array<i64: 1, 8, 512>}, {transform_indices = @transform_4, window_bounds = array<i64: 1, 8, 72>}, {pipeline_mode = #tpu.pipeline_mode<synchronous>, transform_indices = @transform_5, window_bounds = array<i64: 8, 8>}, {transform_indices = @transform_6, window_bounds = array<i64: 1, 2, 8, 72>}, {transform_indices = @transform_7, window_bounds = array<i64: 1, 3, 128>}]} {
    %c0 = arith.constant 0 : index
    %0 = memref.load %arg1[%c0] : memref<3xf32, #tpu.memory_space<smem>>
    %c1 = arith.constant 1 : index
    %1 = memref.load %arg1[%c1] : memref<3xf32, #tpu.memory_space<smem>>
    %c2 = arith.constant 2 : index
    %2 = memref.load %arg1[%c2] : memref<3xf32, #tpu.memory_space<smem>>
    %c0_0 = arith.constant 0 : index
    %c0_1 = arith.constant 0 : index
    %c0_2 = arith.constant 0 : index
    %3 = vector.load %arg2[%c0_0, %c0_1, %c0_2] : memref<1x72x512xf32, #tpu.memory_space<vmem>>, vector<1x72x512xf32>
    %4 = vector.shape_cast %3 : vector<1x72x512xf32> to vector<72x512xf32>
    %c0_3 = arith.constant 0 : index
    %c0_4 = arith.constant 0 : index
    %c0_5 = arith.constant 0 : index
    %5 = vector.load %arg3[%c0_3, %c0_4, %c0_5] : memref<1x8x512xf32, #tpu.memory_space<vmem>>, vector<1x8x512xf32>
    %6 = vector.shape_cast %5 : vector<1x8x512xf32> to vector<8x512xf32>
    %c0_6 = arith.constant 0 : index
    %c0_7 = arith.constant 0 : index
    %c0_8 = arith.constant 0 : index
    %7 = vector.load %arg4[%c0_6, %c0_7, %c0_8] : memref<1x8x512xf32, #tpu.memory_space<vmem>>, vector<1x8x512xf32>
    %8 = vector.shape_cast %7 : vector<1x8x512xf32> to vector<8x512xf32>
    %c0_9 = arith.constant 0 : index
    %c0_10 = arith.constant 0 : index
    %9 = vector.load %arg6[%c0_9, %c0_10] : memref<8x8xf32, #tpu.memory_space<vmem>>, vector<8x8xf32>
    %c0_11 = arith.constant 0 : index
    %c0_12 = arith.constant 0 : index
    %c0_13 = arith.constant 0 : index
    %10 = vector.load %arg5[%c0_11, %c0_12, %c0_13] : memref<1x8x72xf32, #tpu.memory_space<vmem>>, vector<1x8x72xf32>
    %11 = vector.shape_cast %10 : vector<1x8x72xf32> to vector<8x72xf32>
    %cst = arith.constant dense<0.000000e+00> : vector<72x72xf32>
    %12 = tpu.matmul %4, %4, %cst {dimension_numbers = #tpu.dot_dimension_numbers<[1], [1], [0], [0], [0, 0, 1, 0], [], []>} : vector<72x512xf32>, vector<72x512xf32>, vector<72x72xf32> -> vector<72x72xf32>
    %cst_14 = arith.constant dense<0.000000e+00> : vector<8x512xf32>
    %13 = tpu.matmul %11, %4, %cst_14 {dimension_numbers = #tpu.dot_dimension_numbers<[1], [0], [0], [1], [0, 0, 1, 1], [], []>} : vector<8x72xf32>, vector<72x512xf32>, vector<8x512xf32> -> vector<8x512xf32>
    %14 = arith.mulf %8, %13 : vector<8x512xf32>
    %15 = arith.subf %14, %6 : vector<8x512xf32>
    %16 = arith.mulf %15, %15 : vector<8x512xf32>
    %17 = vector.shape_cast %16 : vector<8x512xf32> to vector<1x8x512xf32>
    %cst_15 = arith.constant dense<0.000000e+00> : vector<1xf32>
    %18 = vector.multi_reduction <add>, %17, %cst_15 [1, 2] : vector<1x8x512xf32> to vector<1xf32>
    %19 = vector.shape_cast %18 : vector<1xf32> to vector<1x1x1xf32>
    %20 = vector.extract %19[0, 0, 0] : f32 from vector<1x1x1xf32>
    %21 = vector.broadcast %20 : f32 to vector<1x1xf32>
    %cst_16 = arith.constant dense<0.000000e+00> : vector<72x8xf32>
    %22 = tpu.matmul %4, %15, %cst_16 {dimension_numbers = #tpu.dot_dimension_numbers<[1], [1], [0], [0], [0, 0, 1, 0], [], []>} : vector<72x512xf32>, vector<8x512xf32>, vector<72x8xf32> -> vector<72x8xf32>
    %cst_17 = arith.constant dense<0.000000e+00> : vector<8x72xf32>
    %23 = tpu.matmul %9, %22, %cst_17 {dimension_numbers = #tpu.dot_dimension_numbers<[1], [1], [0], [0], [0, 0, 1, 0], [], []>} : vector<8x8xf32>, vector<72x8xf32>, vector<8x72xf32> -> vector<8x72xf32>
    %24 = vector.broadcast %2 : f32 to vector<8x72xf32>
    %25 = arith.mulf %24, %23 : vector<8x72xf32>
    %26 = vector.broadcast %0 : f32 to vector<8x72xf32>
    %27 = arith.mulf %26, %11 : vector<8x72xf32>
    %28 = arith.addf %25, %27 : vector<8x72xf32>
    %29 = arith.mulf %28, %28 : vector<8x72xf32>
    %30 = vector.shape_cast %29 : vector<8x72xf32> to vector<1x8x72xf32>
    %cst_18 = arith.constant dense<0.000000e+00> : vector<1xf32>
    %31 = vector.multi_reduction <add>, %30, %cst_18 [1, 2] : vector<1x8x72xf32> to vector<1xf32>
    %32 = vector.shape_cast %31 : vector<1xf32> to vector<1x1x1xf32>
    %33 = vector.extract %32[0, 0, 0] : f32 from vector<1x1x1xf32>
    %34 = vector.broadcast %33 : f32 to vector<1x1xf32>
    %cst_19 = arith.constant dense<0.000000e+00> : vector<8x72xf32>
    %35 = tpu.matmul %28, %12, %cst_19 {dimension_numbers = #tpu.dot_dimension_numbers<[1], [0], [0], [1], [0, 0, 1, 1], [], []>} : vector<8x72xf32>, vector<72x72xf32>, vector<8x72xf32> -> vector<8x72xf32>
    %36 = arith.mulf %2, %2 : f32
    %37 = arith.mulf %35, %28 : vector<8x72xf32>
    %38 = vector.shape_cast %37 : vector<8x72xf32> to vector<1x8x72xf32>
    %cst_20 = arith.constant dense<0.000000e+00> : vector<1xf32>
    %39 = vector.multi_reduction <add>, %38, %cst_20 [1, 2] : vector<1x8x72xf32> to vector<1xf32>
    %40 = vector.shape_cast %39 : vector<1xf32> to vector<1x1x1xf32>
    %41 = vector.extract %40[0, 0, 0] : f32 from vector<1x1x1xf32>
    %42 = vector.broadcast %41 : f32 to vector<1x1xf32>
    %43 = vector.broadcast %36 : f32 to vector<1x1xf32>
    %44 = arith.mulf %43, %42 : vector<1x1xf32>
    %45 = vector.broadcast %0 : f32 to vector<1x1xf32>
    %46 = arith.mulf %45, %34 : vector<1x1xf32>
    %47 = arith.addf %44, %46 : vector<1x1xf32>
    %cst_21 = arith.constant 9.99999993E-9 : f32
    %48 = vector.broadcast %cst_21 : f32 to vector<1x1xf32>
    %49 = arith.maximumf %47, %48 : vector<1x1xf32>
    %50 = arith.divf %34, %49 : vector<1x1xf32>
    %51 = vector.broadcast %1 : f32 to vector<1x1xf32>
    %52 = arith.mulf %51, %50 : vector<1x1xf32>
    %53 = vector.broadcast %52 : vector<1x1xf32> to vector<8x72xf32>
    %54 = arith.mulf %53, %28 : vector<8x72xf32>
    %55 = arith.subf %11, %54 : vector<8x72xf32>
    %c0_22 = arith.constant 0 : index
    %c0_23 = arith.constant 0 : index
    %c0_24 = arith.constant 0 : index
    %c0_25 = arith.constant 0 : index
    %56 = vector.load %arg7[%c0_22, %c0_23, %c0_24, %c0_25] : memref<1x2x8x72xf32, #tpu.memory_space<vmem>>, vector<1x1x8x72xf32>
    %57 = vector.shape_cast %56 : vector<1x1x8x72xf32> to vector<8x72xf32>
    %58 = vector.shape_cast %55 : vector<8x72xf32> to vector<1x1x8x72xf32>
    tpu.vector_store %arg7[%c0_22, %c0_23, %c0_24, %c0_25], %58 {strides = array<i32>} : memref<1x2x8x72xf32, #tpu.memory_space<vmem>>, vector<1x1x8x72xf32>,
    %cst_26 = arith.constant dense<0.000000e+00> : vector<8x512xf32>
    %59 = tpu.matmul %55, %4, %cst_26 {dimension_numbers = #tpu.dot_dimension_numbers<[1], [0], [0], [1], [0, 0, 1, 1], [], []>} : vector<8x72xf32>, vector<72x512xf32>, vector<8x512xf32> -> vector<8x512xf32>
    %60 = arith.mulf %8, %59 : vector<8x512xf32>
    %61 = arith.subf %60, %6 : vector<8x512xf32>
    %62 = arith.mulf %61, %61 : vector<8x512xf32>
    %63 = vector.shape_cast %62 : vector<8x512xf32> to vector<1x8x512xf32>
    %cst_27 = arith.constant dense<0.000000e+00> : vector<1xf32>
    %64 = vector.multi_reduction <add>, %63, %cst_27 [1, 2] : vector<1x8x512xf32> to vector<1xf32>
    %65 = vector.shape_cast %64 : vector<1xf32> to vector<1x1x1xf32>
    %66 = vector.extract %65[0, 0, 0] : f32 from vector<1x1x1xf32>
    %67 = vector.broadcast %66 : f32 to vector<1x1xf32>
    %cst_28 = arith.constant dense<0.000000e+00> : vector<72x8xf32>
    %68 = tpu.matmul %4, %61, %cst_28 {dimension_numbers = #tpu.dot_dimension_numbers<[1], [1], [0], [0], [0, 0, 1, 0], [], []>} : vector<72x512xf32>, vector<8x512xf32>, vector<72x8xf32> -> vector<72x8xf32>
    %cst_29 = arith.constant dense<0.000000e+00> : vector<8x72xf32>
    %69 = tpu.matmul %9, %68, %cst_29 {dimension_numbers = #tpu.dot_dimension_numbers<[1], [1], [0], [0], [0, 0, 1, 0], [], []>} : vector<8x8xf32>, vector<72x8xf32>, vector<8x72xf32> -> vector<8x72xf32>
    %70 = vector.broadcast %2 : f32 to vector<8x72xf32>
    %71 = arith.mulf %70, %69 : vector<8x72xf32>
    %72 = vector.broadcast %0 : f32 to vector<8x72xf32>
    %73 = arith.mulf %72, %55 : vector<8x72xf32>
    %74 = arith.addf %71, %73 : vector<8x72xf32>
    %75 = arith.mulf %74, %74 : vector<8x72xf32>
    %76 = vector.shape_cast %75 : vector<8x72xf32> to vector<1x8x72xf32>
    %cst_30 = arith.constant dense<0.000000e+00> : vector<1xf32>
    %77 = vector.multi_reduction <add>, %76, %cst_30 [1, 2] : vector<1x8x72xf32> to vector<1xf32>
    %78 = vector.shape_cast %77 : vector<1xf32> to vector<1x1x1xf32>
    %79 = vector.extract %78[0, 0, 0] : f32 from vector<1x1x1xf32>
    %80 = vector.broadcast %79 : f32 to vector<1x1xf32>
    %cst_31 = arith.constant dense<0.000000e+00> : vector<8x72xf32>
    %81 = tpu.matmul %74, %12, %cst_31 {dimension_numbers = #tpu.dot_dimension_numbers<[1], [0], [0], [1], [0, 0, 1, 1], [], []>} : vector<8x72xf32>, vector<72x72xf32>, vector<8x72xf32> -> vector<8x72xf32>
    %82 = arith.mulf %2, %2 : f32
    %83 = arith.mulf %81, %74 : vector<8x72xf32>
    %84 = vector.shape_cast %83 : vector<8x72xf32> to vector<1x8x72xf32>
    %cst_32 = arith.constant dense<0.000000e+00> : vector<1xf32>
    %85 = vector.multi_reduction <add>, %84, %cst_32 [1, 2] : vector<1x8x72xf32> to vector<1xf32>
    %86 = vector.shape_cast %85 : vector<1xf32> to vector<1x1x1xf32>
    %87 = vector.extract %86[0, 0, 0] : f32 from vector<1x1x1xf32>
    %88 = vector.broadcast %87 : f32 to vector<1x1xf32>
    %89 = vector.broadcast %82 : f32 to vector<1x1xf32>
    %90 = arith.mulf %89, %88 : vector<1x1xf32>
    %91 = vector.broadcast %0 : f32 to vector<1x1xf32>
    %92 = arith.mulf %91, %80 : vector<1x1xf32>
    %93 = arith.addf %90, %92 : vector<1x1xf32>
    %cst_33 = arith.constant 9.99999993E-9 : f32
    %94 = vector.broadcast %cst_33 : f32 to vector<1x1xf32>
    %95 = arith.maximumf %93, %94 : vector<1x1xf32>
    %96 = arith.divf %80, %95 : vector<1x1xf32>
    %97 = vector.broadcast %1 : f32 to vector<1x1xf32>
    %98 = arith.mulf %97, %96 : vector<1x1xf32>
    %99 = vector.broadcast %98 : vector<1x1xf32> to vector<8x72xf32>
    %100 = arith.mulf %99, %74 : vector<8x72xf32>
    %101 = arith.subf %55, %100 : vector<8x72xf32>
    %c0_34 = arith.constant 0 : index
    %c1_35 = arith.constant 1 : index
    %c0_36 = arith.constant 0 : index
    %c0_37 = arith.constant 0 : index
    %102 = vector.load %arg7[%c0_34, %c1_35, %c0_36, %c0_37] : memref<1x2x8x72xf32, #tpu.memory_space<vmem>>, vector<1x1x8x72xf32>
    %103 = vector.shape_cast %102 : vector<1x1x8x72xf32> to vector<8x72xf32>
    %104 = vector.shape_cast %101 : vector<8x72xf32> to vector<1x1x8x72xf32>
    tpu.vector_store %arg7[%c0_34, %c1_35, %c0_36, %c0_37], %104 {strides = array<i32>} : memref<1x2x8x72xf32, #tpu.memory_space<vmem>>, vector<1x1x8x72xf32>,
    %cst_38 = arith.constant dense<0.000000e+00> : vector<8x512xf32>
    %105 = tpu.matmul %101, %4, %cst_38 {dimension_numbers = #tpu.dot_dimension_numbers<[1], [0], [0], [1], [0, 0, 1, 1], [], []>} : vector<8x72xf32>, vector<72x512xf32>, vector<8x512xf32> -> vector<8x512xf32>
    %106 = arith.mulf %8, %105 : vector<8x512xf32>
    %107 = arith.subf %106, %6 : vector<8x512xf32>
    %108 = arith.mulf %107, %107 : vector<8x512xf32>
    %109 = vector.shape_cast %108 : vector<8x512xf32> to vector<1x8x512xf32>
    %cst_39 = arith.constant dense<0.000000e+00> : vector<1xf32>
    %110 = vector.multi_reduction <add>, %109, %cst_39 [1, 2] : vector<1x8x512xf32> to vector<1xf32>
    %111 = vector.shape_cast %110 : vector<1xf32> to vector<1x1x1xf32>
    %112 = vector.extract %111[0, 0, 0] : f32 from vector<1x1x1xf32>
    %113 = vector.broadcast %112 : f32 to vector<1x1xf32>
    %cst_40 = arith.constant 0.000000e+00 : f32
    %114 = vector.broadcast %cst_40 : f32 to vector<3x128xf32>
    %115 = tpu.iota {dimensions = array<i32: 0>} : vector<3x128xi32>
    %c0_i32 = arith.constant 0 : i32
    %116 = vector.broadcast %c0_i32 : i32 to vector<3x128xi32>
    %117 = arith.cmpi eq, %115, %116 : vector<3x128xi32>
    %cst_41 = arith.constant 0.000000e+00 : f32
    %118 = vector.shape_cast %21 : vector<1x1xf32> to vector<1x1xf32>
    %119 = vector.broadcast %118 : vector<1x1xf32> to vector<3x128xf32>
    %120 = vector.broadcast %cst_41 : f32 to vector<3x128xf32>
    %121 = arith.select %117, %119, %120 : vector<3x128xi1>, vector<3x128xf32>
    %122 = arith.addf %114, %121 : vector<3x128xf32>
    %c1_i32 = arith.constant 1 : i32
    %123 = vector.broadcast %c1_i32 : i32 to vector<3x128xi32>
    %124 = arith.cmpi eq, %115, %123 : vector<3x128xi32>
    %cst_42 = arith.constant 0.000000e+00 : f32
    %125 = vector.shape_cast %67 : vector<1x1xf32> to vector<1x1xf32>
    %126 = vector.broadcast %125 : vector<1x1xf32> to vector<3x128xf32>
    %127 = vector.broadcast %cst_42 : f32 to vector<3x128xf32>
    %128 = arith.select %124, %126, %127 : vector<3x128xi1>, vector<3x128xf32>
    %129 = arith.addf %122, %128 : vector<3x128xf32>
    %c2_i32 = arith.constant 2 : i32
    %130 = vector.broadcast %c2_i32 : i32 to vector<3x128xi32>
    %131 = arith.cmpi eq, %115, %130 : vector<3x128xi32>
    %cst_43 = arith.constant 0.000000e+00 : f32
    %132 = vector.shape_cast %113 : vector<1x1xf32> to vector<1x1xf32>
    %133 = vector.broadcast %132 : vector<1x1xf32> to vector<3x128xf32>
    %134 = vector.broadcast %cst_43 : f32 to vector<3x128xf32>
    %135 = arith.select %131, %133, %134 : vector<3x128xi1>, vector<3x128xf32>
    %136 = arith.addf %129, %135 : vector<3x128xf32>
    %c0_44 = arith.constant 0 : index
    %c0_45 = arith.constant 0 : index
    %c0_46 = arith.constant 0 : index
    %137 = vector.load %arg8[%c0_44, %c0_45, %c0_46] : memref<1x3x128xf32, #tpu.memory_space<vmem>>, vector<1x3x128xf32>
    %138 = vector.shape_cast %137 : vector<1x3x128xf32> to vector<3x128xf32>
    %139 = vector.shape_cast %136 : vector<3x128xf32> to vector<1x3x128xf32>
    tpu.vector_store %arg8[%c0_44, %c0_45, %c0_46], %139 {strides = array<i32>} : memref<1x3x128xf32, #tpu.memory_space<vmem>>, vector<1x3x128xf32>,
    return
  }
  func.func @transform_0(%arg0: i32) -> i32 {
    %c0_i32 = arith.constant 0 : i32
    %c0_i32_0 = arith.constant 0 : i32
    return %c0_i32 : i32
  }
  func.func @transform_1(%arg0: i32) -> (i32, i32, i32) {
    %c0_i32 = arith.constant 0 : i32
    %c0_i32_0 = arith.constant 0 : i32
    %c0_i32_1 = arith.constant 0 : i32
    return %arg0, %c0_i32, %c0_i32_0 : i32, i32, i32
  }
  func.func @transform_2(%arg0: i32) -> (i32, i32, i32) {
    %c0_i32 = arith.constant 0 : i32
    %c0_i32_0 = arith.constant 0 : i32
    %c0_i32_1 = arith.constant 0 : i32
    return %arg0, %c0_i32, %c0_i32_0 : i32, i32, i32
  }
  func.func @transform_3(%arg0: i32) -> (i32, i32, i32) {
    %c0_i32 = arith.constant 0 : i32
    %c0_i32_0 = arith.constant 0 : i32
    %c0_i32_1 = arith.constant 0 : i32
    return %arg0, %c0_i32, %c0_i32_0 : i32, i32, i32
  }
  func.func @transform_4(%arg0: i32) -> (i32, i32, i32) {
    %c0_i32 = arith.constant 0 : i32
    %c0_i32_0 = arith.constant 0 : i32
    %c0_i32_1 = arith.constant 0 : i32
    return %arg0, %c0_i32, %c0_i32_0 : i32, i32, i32
  }
  func.func @transform_5(%arg0: i32) -> (i32, i32) {
    %c0_i32 = arith.constant 0 : i32
    %c0_i32_0 = arith.constant 0 : i32
    %c0_i32_1 = arith.constant 0 : i32
    return %c0_i32, %c0_i32_0 : i32, i32
  }
  func.func @transform_6(%arg0: i32) -> (i32, i32, i32, i32) {
    %c0_i32 = arith.constant 0 : i32
    %c0_i32_0 = arith.constant 0 : i32
    %c0_i32_1 = arith.constant 0 : i32
    %c0_i32_2 = arith.constant 0 : i32
    return %arg0, %c0_i32, %c0_i32_0, %c0_i32_1 : i32, i32, i32, i32
  }
  func.func @transform_7(%arg0: i32) -> (i32, i32, i32) {
    %c0_i32 = arith.constant 0 : i32
    %c0_i32_0 = arith.constant 0 : i32
    %c0_i32_1 = arith.constant 0 : i32
    return %arg0, %c0_i32, %c0_i32_0 : i32, i32, i32
  }
}

</mosaic_0001>

<bundles_post_ra>
// kernel: tpu_custom_call.1
= control target key start
LH: loop header
LB: loop body
LE: loop exit
PB: predicated region body
PF: predicated region fallthrough
CT: control target
= control target key end

     0   :  { %s3176_s0 = inlined_call_operand.hbm [shape: f32[3], index: 0, kind: input, shape index: {}]   ;;  %s3177_s1 = inlined_call_operand.hbm [shape: f32[2,72,512], index: 1, kind: input, shape index: {}]   ;;  %s3178_s2 = inlined_call_operand.hbm [shape: f32[2,8,512], index: 2, kind: input, shape index: {}]   ;;  %s3179_s3 = inlined_call_operand.hbm [shape: f32[2,8,512], index: 3, kind: input, shape index: {}]   ;;  %s3180_s4 = inlined_call_operand.hbm [shape: f32[2,8,72], index: 4, kind: input, shape index: {}]   ;;  %s3181_s5 = inlined_call_operand.hbm [shape: f32[8,8], index: 5, kind: input, shape index: {}]   ;;  %s3182_s6 = inlined_call_operand.hbm [shape: f32[2,2,8,72], index: 6, kind: output, shape index: {0}]   ;;  %s3183_s7 = inlined_call_operand.vmem [shape: f32[2,3,128], index: 7, kind: output, shape index: {1}]  }
   0x1   :  { %3262 = sst [smem:[#allocation61_spill]] %s3176_s0 }
   0x2   :  { %3263 = sst [smem:[#allocation62_spill]] %s3178_s2 }
   0x3   :  { %3264 = sst [smem:[#allocation63_spill]] %s3181_s5 }
   0x4   :  { %13 = vsyncpa [#allocation5], 0 }
   0x5   :  { %14 = vsyncpa [#allocation3], 0 }
   0x6   :  { %16 = vsyncpa [#allocation3 + $0x1], 0 }
   0x7   :  { %17 = vsyncpa [#allocation8], 0 }
   0x8   :  { %19 = vsyncpa [#allocation8 + $0x1], 0 }
   0x9   :  { %20 = vsyncpa [#allocation11], 0 }
   0xa   :  { %22 = vsyncpa [#allocation11 + $0x1], 0 }
   0xb   :  { %23 = vsyncpa [#allocation4], 0 }
   0xc   :  { %25 = vsyncpa [#allocation4 + $0x1], 0  ;;  %s2326_s24 = smov 0   ;;  %s2328_s25 = smov 0  }
   0xd   :  { %s2330_s26 = smov 0   ;;  %s2332_s27 = smov 0  }
   0xe LB: > { %3265 = sst [smem:[#allocation20_spill]] %s2266_s24  ;;  %s2347_s28 = sadd.s32 4294967295, %s2278_s27   ;;  %s2278_s27 = sphi %s2332_s27, %s3369_s27   ;;  %s2274_s26 = sphi %s2330_s26, %s3371_s26   ;;  %s2270_s25 = sphi %s2328_s25, %s3373_s25   ;;  %s2266_s24 = sphi %s2326_s24, %s3372_s24  }
   0xf   : > { %3266 = sst [smem:[#allocation21_spill]] %s2274_s26  ;;  %s1825_s29 = sadd.s32 4294967294, %s2278_s27  }
  0x10   : > { %s2351_s30 = sadd.s32 1, %s2278_s27   ;;  %s59_s8 = sadd.s32 1, %s2274_s26 }
  0x11   : > { %3267 = sst [smem:[#allocation22_spill]] %s2351_s30  ;;  %s56_s9 = ssub.s32 %s2278_s27, %s2351_s30 }
  0x12   : > { %p66_p0 = scmp.ne.s32.totalorder %s2274_s26, %s2270_s25  ;;  %p57_p1 = scmp.eq.s32.totalorder %s56_s9, 0 }
  0x13   : > { %p72_p2 = scmp.ne.s32.totalorder %s2270_s25, %s2266_s24  ;;  %p3186_p3 = scmp.eq.s32.totalorder %s2347_s28, 0 }
  0x14   : > { %p195_p4 = scmp.eq.s32.totalorder %s2347_s28, 1  ;;  %p201_p7 = scmp.eq.s32.totalorder %s1825_s29, 1 }
  0x15   : > { %s2363_s10 = scalar_select %p57_p1, %s2274_s26, %s59_s8  }
  0x16   : > { %p2367_p5 = por %p3186_p3, %p72_p2  ;;  %p2374_p6 = por %p195_p4, %p66_p0 }
  0x17   : > { %3268 = sst [smem:[#allocation23_spill]] %s2363_s10  ;;  %p1826_p8 = scmp.ge.s32.totalorder %s2278_s27, 1 }
  0x18   : > { %p234_p9 = scmp.lt.s32.totalorder %s2278_s27, 3  ;;  %p2380_p10 = por %p201_p7, %p72_p2 }
  0x19   : > { %s3273_s5 = sld [smem:[#allocation63_spill]]  ;;  %s2280_s18 = smov [#allocation12]  }
  0x1a   : > { %s3271_s13 = scalar_select %p2380_p10, 1, 0 }
  0x1b   : > { %p2387_p11 = pnand %p1826_p8, %p234_p9  ;;  %s258_s19 = sshll.u32 %s2280_s18, 4  ;;  %s259_s19 = int_to_ptr.vmem [resolvable:$true] %s258_s19 }
  0x1c   : > { %3272 = sst [smem:[#allocation24_spill]] %s3271_s13  ;;  %p67_p1 = scmp.eq.s32.totalorder %s2278_s27, 0 }
  0x1d   : > { %p1927_p13 = pneg %p2387_p11  ;;  %p1953_p4 = scmp.lt.s32.totalorder %s2278_s27, 2 }
  0x1e   : > { %p68_p7 = por %p67_p1, %p66_p0  ;;  %s2406_s21 = sand.u32 1, %s2274_s26  }
  0x1f   : > { %s256_s16 = sshll.u32 %s3273_s5, 4  ;;  %p2397_p2 = pnand %p1927_p13, %p3186_p3  ;;  %s257_s16 = int_to_ptr.hbm [resolvable:$true] %s256_s16 }
  0x20   : > { %s3187_s22 = sand.u32 1, %s2278_s27   ;;  %p2411_p8 = pnand %p1953_p4, %p68_p7 }
  0x21   : > { %1933 = dma.hbm_to_vmem [thread:$0]  (!%p2397_p2), %s257_s16, 128, %s259_s19, [#allocation11]  }
  0x22   : > { %s3185_s29 = sshll.u32 %s2406_s21, 5  ;;  %s1889_s8 = sshll.u32 %s2278_s27, 5 }
  0x23   : > { %s3277_s2 = sld [smem:[#allocation62_spill]]  ;;  %s295_s18 = scalar_lea.vmem [#allocation7], %s3185_s29 }
  0x24   : > { %s304_s5 = sshll.u32 %s295_s18, 4  ;;  %s2424_s16 = scalar_lea.sflag [#allocation8], %s3187_s22  ;;  %s305_s5 = int_to_ptr.vmem [resolvable:$true] %s304_s5 }
  0x25   : > { %p2065_p9 = pneg %p2411_p8 }
  0x29   : > { %s300_s15 = scalar_lea.hbm %s3277_s2, %s1889_s8  ;;  %s2068_s18 = scalar_lea.hbm %s3277_s2, 64 }
  0x2a   : > { %s302_s10 = sshll.u32 %s300_s15, 4  ;;  %s303_s10 = int_to_ptr.hbm [resolvable:$true] %s302_s10 }
  0x2b   : > { %s2061_s19 = sshra.s32 %s303_s10, 4  ;;  %s2062_s19 = int_to_ptr.hbm [resolvable:$true] %s2061_s19 }
  0x2c   : > { %s2063_s26 = scalar_lea.hbm %s2062_s19, 32  ;;  %p2069_p4 = scmp.lt.s32.totalorder %s2062_s19, %s3277_s2 }
  0x2d   : > { %p2064_p0 = scmp.ne.s32.totalorder %s2062_s19, %s2063_s26  ;;  %p2070_p7 = scmp.lt.s32.totalorder %s2068_s18, %s2063_s26 }
  0x2f   : > { %p2066_p13 = pnand %p2065_p9, %p2064_p0  ;;  %p2071_p12 = por %p2070_p7, %p2069_p4 }
  0x31   : > { %p2067_p1 = pneg %p2066_p13 }
  0x33   : > { %p2072_p3 = pnand %p2071_p12, %p2067_p1 }
  0x35   : > { %2075 = shalt.err (!%p2072_p3)
}
  0x36   : > { %1940 = dma.hbm_to_vmem [thread:$0]  (!%p2411_p8), %s303_s10, 512, %s305_s5, %s2424_s16  }
  0x37   : > { %s320_s9 = scalar_lea.hbm %s3179_s3, %s1889_s8  ;;  %s3278_s0 = sld [smem:[#allocation61_spill]] }
  0x38   : > { %s2281_s26 = smov [#allocation2]   ;;  %s1892_s19 = smul.u32 288, %s2406_s21 }
  0x39   : > { %s1893_s18 = smul.u32 288, %s2278_s27  ;;  %s322_s15 = sshll.u32 %s320_s9, 4  ;;  %s2453_s15 = int_to_ptr.hbm [resolvable:$true] %s322_s15 }
  0x3a   : > { %s273_s10 = scalar_lea.vmem [#allocation6], %s1892_s19  ;;  %s270_s13 = scalar_lea.sflag [#allocation3], %s2406_s21 }
  0x3b   : > { %s278_s5 = scalar_lea.hbm %s3177_s1, %s1893_s18  ;;  %s281_s30 = sshll.u32 %s273_s10, 4  ;;  %s282_s30 = int_to_ptr.vmem [resolvable:$true] %s281_s30 }
  0x3c   : > { %s279_s22 = sshll.u32 %s278_s5, 4  ;;  %s2113_s2 = scalar_lea.hbm %s3177_s1, 576  ;;  %s280_s22 = int_to_ptr.hbm [resolvable:$true] %s279_s22 }
  0x3d   : > { %s246_s29 = sshll.u32 %s3278_s0, 4  ;;  %s2106_s8 = sshra.s32 %s280_s22, 4  ;;  %s247_s29 = int_to_ptr.hbm [resolvable:$true] %s246_s29  ;;  %s2107_s8 = int_to_ptr.hbm [resolvable:$true] %s2106_s8 }
  0x3e   : > { %1930 = dma.hbm_to_smem (!%p2397_p2), %s247_s29, 16, %s2281_s26, [#allocation5]  }
  0x3f   : > { %s2108_s20 = scalar_lea.hbm %s2107_s8, 288  ;;  %p2114_p0 = scmp.lt.s32.totalorder %s2107_s8, %s3177_s1 }
  0x40   : > { %p2109_p3 = scmp.ne.s32.totalorder %s2107_s8, %s2108_s20  ;;  %p2115_p13 = scmp.lt.s32.totalorder %s2113_s2, %s2108_s20 }
  0x42   : > { %p2111_p12 = pnand %p2109_p3, %p2065_p9  ;;  %p2116_p1 = por %p2115_p13, %p2114_p0 }
  0x44   : > { %p2112_p2 = pneg %p2111_p12 }
  0x46   : > { %p2117_p4 = pnand %p2116_p1, %p2112_p2 }
  0x48   : > { %2120 = shalt.err (!%p2117_p4)
}
  0x49   : > { %s2282_s26 = smov 512   ;;  %s2283_s19 = smov 32  }
  0x4a   : > { %1937 = dma.hbm_to_vmem [thread:$0]  (!%p2411_p8), %s280_s22, 4608, %s282_s30, %s270_s13, %s2282_s26, %s2282_s26, %s2283_s19  }
  0x4b   : > { %s3279_s18 = sshll.u32 %s2406_s21, 5  ;;  %s1837_s9 = sshll.u32 %s2406_s21, 3 }
  0x4c   : > { %s315_s5 = scalar_lea.vmem [#allocation9], %s3279_s18  ;;  %s2136_s14 = sshra.s32 %s2453_s15, 4  ;;  %s2137_s14 = int_to_ptr.hbm [resolvable:$true] %s2136_s14 }
  0x4d   : > { %s324_s10 = sshll.u32 %s315_s5, 4  ;;  %s2138_s8 = scalar_lea.hbm %s2137_s14, 32  ;;  %s325_s10 = int_to_ptr.vmem [resolvable:$true] %s324_s10 }
  0x4e   : > { %p2139_p7 = scmp.ne.s32.totalorder %s2137_s14, %s2138_s8  ;;  %s2143_s24 = scalar_lea.hbm %s3179_s3, 64 }
  0x4f   : > { %p2144_p2 = scmp.lt.s32.totalorder %s2137_s14, %s3179_s3  ;;  %p2145_p0 = scmp.lt.s32.totalorder %s2143_s24, %s2138_s8 }
  0x50   : > { %p2141_p3 = pnand %p2139_p7, %p2065_p9 }
  0x51   : > { %p2146_p13 = por %p2145_p0, %p2144_p2 }
  0x52   : > { %p2142_p12 = pneg %p2141_p3 }
  0x54   : > { %p2147_p1 = pnand %p2146_p13, %p2142_p12 }
  0x56   : > { %2150 = shalt.err (!%p2147_p1)
}
  0x57   : > { %1943 = dma.hbm_to_vmem [thread:$0]  (!%p2411_p8), %s2453_s15, 512, %s325_s10, %s2424_s16  }
  0x58   : > { %s1838_s21 = sshll.u32 %s2278_s27, 3  ;;  %s335_s30 = scalar_lea.vmem [#allocation10], %s1837_s9 }
  0x59   : > { %s343_s22 = sshll.u32 %s335_s30, 4  ;;  %s339_s0 = scalar_lea.hbm %s3180_s4, %s1838_s21  ;;  %s344_s22 = int_to_ptr.vmem [resolvable:$true] %s343_s22 }
  0x5a   : > { %s341_s19 = sshll.u32 %s339_s0, 4  ;;  %s3280_s18 = sand.u32 1, %s2278_s27   ;;  %s342_s19 = int_to_ptr.hbm [resolvable:$true] %s341_s19 }
  0x5b   : > { %s332_s5 = scalar_lea.sflag [#allocation11], %s3280_s18  ;;  %s2166_s14 = sshra.s32 %s342_s19, 4  ;;  %s2167_s14 = int_to_ptr.hbm [resolvable:$true] %s2166_s14 }
  0x5c   : > { %s2168_s8 = scalar_lea.hbm %s2167_s14, 8  ;;  %s2173_s10 = scalar_lea.hbm %s3180_s4, 16 }
  0x5d   : > { %p2169_p4 = scmp.ne.s32.totalorder %s2167_s14, %s2168_s8  ;;  %p2174_p12 = scmp.lt.s32.totalorder %s2167_s14, %s3180_s4 }
  0x5e   : > { %p2175_p2 = scmp.lt.s32.totalorder %s2173_s10, %s2168_s8 }
  0x5f   : > { %p2171_p7 = pnand %p2169_p4, %p2065_p9 }
  0x60   : > { %p2176_p0 = por %p2175_p2, %p2174_p12 }
  0x61   : > { %p2172_p3 = pneg %p2171_p7 }
  0x63   : > { %p2177_p13 = pnand %p2176_p0, %p2172_p3 }
  0x65   : > { %2180 = shalt.err (!%p2177_p13)
}
  0x66   : > { %1946 = dma.hbm_to_vmem [thread:$0]  (!%p2411_p8), %s342_s19, 128, %s344_s22, %s332_s5  }
  0x67   : > { %352 = sbr.rel (%p2387_p11) target bundleno = 2266 (0x8da), region = 44 }
  0x6c   : > { %p3281_p9 = scmp.eq.s32.totalorder %s2347_s28, 0 }
  0x6e   : > { %2241 = dma.done.wait (%p3281_p9), [#allocation5], 16   ;;  %p3282_p1 = pmov %p3281_p9 }
  0x6f   : > { %s2508_s2 = sand.u32 1, %s2270_s25  }
  0x70   : > { %2243 = vsyncadd (%p3282_p1), [#allocation5], 4294967280  ;;  %s1894_s24 = smul.u32 288, %s2508_s2  ;;  %s360_s29 = scalar_lea.sflag [#allocation3], %s2508_s2 }
  0x72   : > { %s2512_s21 = scalar_lea.vmem [#allocation6], %s1894_s24 }
  0x73   : > { %2245 = dma.done.wait (%p2367_p5), %s360_s29, 4608  }
  0x74   : > { %2247 = vsyncadd (%p2367_p5), %s360_s29, 4294962688  ;;  %s369_s17 = sand.u32 1, %s2347_s28   ;;  %s1841_s23 = sshll.u32 %s2508_s2, 5 }
  0x75   : > { %s370_s30 = scalar_lea.sflag [#allocation8], %s369_s17  ;;  %s2520_s22 = scalar_lea.vmem [#allocation7], %s1841_s23 }
  0x76   : > { %2249 = dma.done.wait (%p2367_p5), %s370_s30, 1024  }
  0x77   : > { %2251 = vsyncadd (%p2367_p5), %s370_s30, 4294966272  ;;  %s1843_s13 = sshll.u32 %s2508_s2, 3  ;;  %s2527_s26 = scalar_lea.vmem [#allocation9], %s1841_s23 }
  0x78   : > { %s390_s0 = scalar_lea.sflag [#allocation11], %s369_s17  ;;  %s2529_s19 = scalar_lea.vmem [#allocation10], %s1843_s13 }
  0x79   : > { %2253 = dma.done.wait (%p2367_p5), %s390_s0, 128  }
  0x7a   : > { %2255 = vsyncadd (%p2367_p5), %s390_s0, 4294967168  ;;  %p3283_p11 = pmov %p3282_p1 }
  0x7b   : > { %p3284_p8 = pmov %p3282_p1 }
  0x7c   : > { %2257 = dma.done.wait (%p3283_p11), [#allocation11], 128  }
  0x7d   : > { %2259 = vsyncadd (%p3284_p8), [#allocation11], 4294967168 }
  0x7e   : > { %404 = sfence }
  0x7f   : > { %v2540_v0 = vld [vmem:[%s2512_s21 + $0x108] sm:$0xff]  ;;  %v2543_v1 = vld [vmem:[%s2512_s21 + $0x110] sm:$0xff]  ;;  %v2546_v2 = vld [vmem:[%s2512_s21 + $0x118] sm:$0xff]  ;;  %vm679_vm0 = vcmask 588800   ;;  %vm963_vm1 = vcmask 64512   ;;  %s454_s11 = sld [smem:[#allocation2]] }
  0x80   : > { %3285 = vst [vmem:[#allocation25_spill] sm:$0xff] %v2543_v1  ;;  %554 = vmatpush.xpose.msra.mxu1 %v2540_v0  ;;  %598 = vmatpush.xpose.msra.mxu2 %v2543_v1  ;;  %v2551_v3 = vld [vmem:[%s2512_s21 + $0x100] sm:$0xff]  ;;  %v2556_v4 = vld [vmem:[%s2512_s21 + $0xe8] sm:$0xff]  ;;  %v2559_v5 = vld [vmem:[%s2512_s21 + $0xf0] sm:$0xff]  ;;  %s2952_s18 = sld [smem:[#allocation2 + $0x2]]  ;;  %s1845_s10 = sshll.u32 %s2508_s2, 4 }
  0x81   : > { %3286 = vst [vmem:[#allocation26_spill] sm:$0xff] %v2546_v2  ;;  %642 = vmatpush.xpose.msra.mxu3 %v2546_v2  ;;  %510 = vmatpush.xpose.msra.mxu0 %v2551_v3  ;;  %v2562_v6 = vld [vmem:[%s2512_s21 + $0xf8] sm:$0xff]  ;;  %v2565_v7 = vld [vmem:[%s2512_s21 + $0xe0] sm:$0xff]  ;;  %v2572_v8 = vld [vmem:[%s2512_s21 + $0xc8] sm:$0xff]  ;;  %s2972_s15 = sld [smem:[#allocation2 + $0x1]]  ;;  %s2985_s9 = scalar_lea.vmem [#allocation13], %s1845_s10 }
  0x82   : > { %3287 = vst [vmem:[#allocation27_spill] sm:$0xff] %v2559_v5  ;;  %v2575_v9 = vld [vmem:[%s2512_s21 + $0xd0] sm:$0xff]  ;;  %v2578_v10 = vld [vmem:[%s2512_s21 + $0xd8] sm:$0xff]  ;;  %v2581_v11 = vld [vmem:[%s2512_s21 + $0xc0] sm:$0xff]  ;;  %s1635_s13 = sshll.u32 %s2985_s9, 4  ;;  %s1619_s0 = scalar_lea.sflag [#allocation4], %s2508_s2  ;;  %s1636_s13 = int_to_ptr.vmem [resolvable:$true] %s1635_s13 }
  0x83   : > { %3288 = vst [vmem:[#allocation28_spill] sm:$0xff] %v2562_v6  ;;  %v2588_v12 = vld [vmem:[%s2512_s21 + $0xa8] sm:$0xff]  ;;  %v2591_v13 = vld [vmem:[%s2512_s21 + $0xb0] sm:$0xff]  ;;  %v2594_v14 = vld [vmem:[%s2512_s21 + $0xb8] sm:$0xff] }
  0x84   : > { %555 = vmatpush.xpose.msra.mxu1 %v2556_v4  ;;  %599 = vmatpush.xpose.msra.mxu2 %v2559_v5  ;;  %3289 = vst [vmem:[#allocation29_spill] sm:$0xff] %v2575_v9  ;;  %v2597_v15 = vld [vmem:[%s2512_s21 + $0xa0] sm:$0xff]  ;;  %v2604_v16 = vld [vmem:[%s2512_s21 + $0x88] sm:$0xff]  ;;  %v2607_v17 = vld [vmem:[%s2512_s21 + $0x90] sm:$0xff] }
  0x85   : > { %643 = vmatpush.xpose.msra.mxu3 %v2562_v6  ;;  %511 = vmatpush.xpose.msra.mxu0 %v2565_v7  ;;  %3290 = vst [vmem:[#allocation30_spill] sm:$0xff] %v2578_v10  ;;  %v2610_v18 = vld [vmem:[%s2512_s21 + $0x98] sm:$0xff]  ;;  %v2613_v19 = vld [vmem:[%s2512_s21 + $0x80] sm:$0xff]  ;;  %v2620_v20 = vld [vmem:[%s2512_s21 + $0x68] sm:$0xff] }
  0x86   : > { %3291 = vst [vmem:[#allocation31_spill] sm:$0xff] %v2588_v12  ;;  %v2623_v21 = vld [vmem:[%s2512_s21 + $0x70] sm:$0xff]  ;;  %v2626_v22 = vld [vmem:[%s2512_s21 + $0x78] sm:$0xff]  ;;  %v2629_v23 = vld [vmem:[%s2512_s21 + $0x60] sm:$0xff]  ;;  %s1054_s14 = smul.f32 %s2952_s18, %s2952_s18 }
  0x87   : > { %3292 = vst [vmem:[#allocation32_spill] sm:$0xff] %v2591_v13  ;;  %v2636_v24 = vld [vmem:[%s2512_s21 + $0x48] sm:$0xff]  ;;  %v2639_v25 = vld [vmem:[%s2512_s21 + $0x50] sm:$0xff]  ;;  %v2642_v26 = vld [vmem:[%s2512_s21 + $0x58] sm:$0xff] }
  0x88   : > { %556 = vmatpush.xpose.msra.mxu1 %v2572_v8  ;;  %600 = vmatpush.xpose.msra.mxu2 %v2575_v9  ;;  %3293 = vst [vmem:[#allocation33_spill] sm:$0xff] %v2594_v14  ;;  %v2645_v27 = vld [vmem:[%s2512_s21 + $0x40] sm:$0xff]  ;;  %v2652_v28 = vld [vmem:[%s2512_s21 + $0x28] sm:$0xff]  ;;  %v2655_v29 = vld [vmem:[%s2512_s21 + $0x30] sm:$0xff] }
  0x89   : > { %644 = vmatpush.xpose.msra.mxu3 %v2578_v10  ;;  %512 = vmatpush.xpose.msra.mxu0 %v2581_v11  ;;  %3294 = vst [vmem:[#allocation34_spill] sm:$0xff] %v2597_v15  ;;  %v2658_v30 = vld [vmem:[%s2512_s21 + $0x38] sm:$0xff]  ;;  %v2661_v31 = vld [vmem:[%s2512_s21 + $0x20] sm:$0xff]  ;;  %v2668_v32 = vld [vmem:[%s2512_s21 + $0x8] sm:$0xff] }
  0x8a   : > { %3295 = vst [vmem:[#allocation35_spill] sm:$0xff] %v2604_v16  ;;  %v2671_v33 = vld [vmem:[%s2512_s21 + $0x10] sm:$0xff]  ;;  %v2674_v34 = vld [vmem:[%s2512_s21 + $0x18] sm:$0xff]  ;;  %v2677_v35 = vld [vmem:[%s2512_s21] sm:$0xff] }
  0x8b   : > { %3296 = vst [vmem:[#allocation36_spill] sm:$0xff] %v2607_v17  ;;  %v2756_v36 = vld [vmem:[%s2529_s19] sm:$0xff] }
  0x8c   : > { %557 = vmatpush.xpose.msra.mxu1 %v2588_v12  ;;  %601 = vmatpush.xpose.msra.mxu2 %v2591_v13  ;;  %3297 = vst [vmem:[#allocation37_spill] sm:$0xff] %v2610_v18 }
  0x8d   : > { %645 = vmatpush.xpose.msra.mxu3 %v2594_v14  ;;  %513 = vmatpush.xpose.msra.mxu0 %v2597_v15  ;;  %3298 = vst [vmem:[#allocation38_spill] sm:$0xff] %v2613_v19 }
  0x8e   : > { %3299 = vst [vmem:[#allocation39_spill] sm:$0xff] %v2620_v20 }
  0x8f   : > { %3300 = vst [vmem:[#allocation40_spill] sm:$0xff] %v2623_v21 }
  0x90   : > { %558 = vmatpush.xpose.msra.mxu1 %v2604_v16  ;;  %602 = vmatpush.xpose.msra.mxu2 %v2607_v17  ;;  %3301 = vst [vmem:[#allocation41_spill] sm:$0xff] %v2626_v22 }
  0x91   : > { %646 = vmatpush.xpose.msra.mxu3 %v2610_v18  ;;  %514 = vmatpush.xpose.msra.mxu0 %v2613_v19  ;;  %3302 = vst [vmem:[#allocation42_spill] sm:$0xff] %v2629_v23 }
  0x92   : > { %3303 = vst [vmem:[#allocation43_spill] sm:$0xff] %v2636_v24 }
  0x93   : > { %3304 = vst [vmem:[#allocation44_spill] sm:$0xff] %v2639_v25 }
  0x94   : > { %559 = vmatpush.xpose.msra.mxu1 %v2620_v20  ;;  %603 = vmatpush.xpose.msra.mxu2 %v2623_v21  ;;  %3305 = vst [vmem:[#allocation45_spill] sm:$0xff] %v2642_v26 }
  0x95   : > { %647 = vmatpush.xpose.msra.mxu3 %v2626_v22  ;;  %515 = vmatpush.xpose.msra.mxu0 %v2629_v23  ;;  %3306 = vst [vmem:[#allocation46_spill] sm:$0xff] %v2645_v27 }
  0x96   : > { %3307 = vst [vmem:[#allocation47_spill] sm:$0xff] %v2652_v28 }
  0x97   : > { %3308 = vst [vmem:[#allocation48_spill] sm:$0xff] %v2658_v30 }
  0x98   : > { %560 = vmatpush.xpose.msra.mxu1 %v2636_v24  ;;  %604 = vmatpush.xpose.msra.mxu2 %v2639_v25  ;;  %3309 = vst [vmem:[#allocation49_spill] sm:$0xff] %v2661_v31 }
  0x99   : > { %648 = vmatpush.xpose.msra.mxu3 %v2642_v26  ;;  %516 = vmatpush.xpose.msra.mxu0 %v2645_v27  ;;  %3310 = vst [vmem:[#allocation50_spill] sm:$0xff] %v2668_v32 }
  0x9a   : > { %3311 = vst [vmem:[#allocation51_spill] sm:$0xff] %v2756_v36 }
  0x9c   : > { %561 = vmatpush.xpose.msra.mxu1 %v2652_v28  ;;  %605 = vmatpush.xpose.msra.mxu2 %v2655_v29 }
  0x9d   : > { %649 = vmatpush.xpose.msra.mxu3 %v2658_v30  ;;  %517 = vmatpush.xpose.msra.mxu0 %v2661_v31 }
  0xa0   : > { %562 = vmatpush.xpose.msra.mxu1 %v2668_v32  ;;  %606 = vmatpush.xpose.msra.mxu2 %v2671_v33 }
  0xa1   : > { %650 = vmatpush.xpose.msra.mxu3 %v2674_v34  ;;  %518 = vmatpush.xpose.msra.mxu0 %v2677_v35 }
  0xa3   : > { %563 = vmatmul.f32.vlgmr.msra.gmra.mxu1 %v2668_v32  ;;  %607 = vmatmul.f32.vlgmr.msra.gmra.mxu2 %v2671_v33 }
  0xa4   : > { %730 = vmatpush.msrb.mxu2 %v2543_v1  ;;  %651 = vmatmul.f32.vlgmr.msra.gmra.mxu3 %v2674_v34 }
  0xa5   : > { %750 = vmatpush.msrb.mxu3 %v2546_v2  ;;  %519 = vmatmul.f32.vlgmr.msra.gmra.mxu0 %v2677_v35 }
  0xa6   : > { %731 = vmatpush.msrb.mxu2 %v2559_v5  ;;  %690 = vmatpush.msrb.mxu0 %v2551_v3 }
  0xa7   : > { %710 = vmatpush.msrb.mxu1 %v2540_v0  ;;  %751 = vmatpush.msrb.mxu3 %v2562_v6 }
  0xa8   : > { %732 = vmatpush.msrb.mxu2 %v2575_v9  ;;  %691 = vmatpush.msrb.mxu0 %v2565_v7 }
  0xa9   : > { %711 = vmatpush.msrb.mxu1 %v2556_v4  ;;  %752 = vmatpush.msrb.mxu3 %v2578_v10 }
  0xaa   : > { %733 = vmatpush.msrb.mxu2 %v2591_v13  ;;  %692 = vmatpush.msrb.mxu0 %v2581_v11 }
  0xab   : > { %712 = vmatpush.msrb.mxu1 %v2572_v8  ;;  %753 = vmatpush.msrb.mxu3 %v2594_v14 }
  0xac   : > { %566 = vmatmul.f32.gmra.mxu1 %v2652_v28  ;;  %610 = vmatmul.f32.gmra.mxu2 %v2655_v29 }
  0xad   : > { %654 = vmatmul.f32.gmra.mxu3 %v2658_v30  ;;  %522 = vmatmul.f32.gmra.mxu0 %v2661_v31 }
  0xae   : > { %713 = vmatpush.msrb.mxu1 %v2588_v12  ;;  %734 = vmatpush.msrb.mxu2 %v2607_v17 }
  0xaf   : > { %693 = vmatpush.msrb.mxu0 %v2597_v15  ;;  %754 = vmatpush.msrb.mxu3 %v2610_v18 }
  0xb0   : > { %714 = vmatpush.msrb.mxu1 %v2604_v16  ;;  %735 = vmatpush.msrb.mxu2 %v2623_v21 }
  0xb1   : > { %694 = vmatpush.msrb.mxu0 %v2613_v19  ;;  %755 = vmatpush.msrb.mxu3 %v2626_v22 }
  0xb2   : > { %715 = vmatpush.msrb.mxu1 %v2620_v20  ;;  %736 = vmatpush.msrb.mxu2 %v2639_v25 }
  0xb3   : > { %695 = vmatpush.msrb.mxu0 %v2629_v23  ;;  %756 = vmatpush.msrb.mxu3 %v2642_v26 }
  0xb4   : > { %569 = vmatmul.f32.gmra.mxu1 %v2636_v24  ;;  %613 = vmatmul.f32.gmra.mxu2 %v2639_v25 }
  0xb5   : > { %657 = vmatmul.f32.gmra.mxu3 %v2642_v26  ;;  %525 = vmatmul.f32.gmra.mxu0 %v2645_v27 }
  0xb6   : > { %716 = vmatpush.msrb.mxu1 %v2636_v24  ;;  %737 = vmatpush.msrb.mxu2 %v2655_v29 }
  0xb7   : > { %696 = vmatpush.msrb.mxu0 %v2645_v27  ;;  %757 = vmatpush.msrb.mxu3 %v2658_v30 }
  0xb8   : > { %717 = vmatpush.msrb.mxu1 %v2652_v28  ;;  %738 = vmatpush.msrb.mxu2 %v2671_v33 }
  0xb9   : > { %697 = vmatpush.msrb.mxu0 %v2661_v31  ;;  %758 = vmatpush.msrb.mxu3 %v2674_v34 }
  0xba   : > { %718 = vmatpush.msrb.mxu1 %v2668_v32 }
  0xbb   : > { %698 = vmatpush.msrb.mxu0 %v2677_v35 }
  0xbc   : > { %572 = vmatmul.f32.gmra.mxu1 %v2620_v20  ;;  %616 = vmatmul.f32.gmra.mxu2 %v2623_v21 }
  0xbd   : > { %660 = vmatmul.f32.gmra.mxu3 %v2626_v22  ;;  %528 = vmatmul.f32.gmra.mxu0 %v2629_v23  ;;  %v2799_v23 = vld [vmem:[%s2520_s22 + $0x8] sm:$0xff] }
  0xc4   : > { %575 = vmatmul.f32.gmra.mxu1 %v2604_v16  ;;  %619 = vmatmul.f32.gmra.mxu2 %v2607_v17  ;;  %v2803_v16 = vld [vmem:[%s2520_s22] sm:$0xff] }
  0xc5   : > { %663 = vmatmul.f32.gmra.mxu3 %v2610_v18  ;;  %531 = vmatmul.f32.gmra.mxu0 %v2613_v19 }
  0xcc   : > { %578 = vmatmul.f32.gmra.mxu1 %v2588_v12  ;;  %622 = vmatmul.f32.gmra.mxu2 %v2591_v13 }
  0xcd   : > { %666 = vmatmul.f32.gmra.mxu3 %v2594_v14  ;;  %534 = vmatmul.f32.gmra.mxu0 %v2597_v15  ;;  %v2793_v14 = vld [vmem:[%s2527_s26 + $0x8] sm:$0xff] }
  0xce   : > { %3312 = vst [vmem:[#allocation52_spill] sm:$0xff] %v2793_v14 }
  0xd4   : > { %581 = vmatmul.f32.gmra.mxu1 %v2572_v8  ;;  %625 = vmatmul.f32.gmra.mxu2 %v2575_v9 }
  0xd5   : > { %669 = vmatmul.f32.gmra.mxu3 %v2578_v10  ;;  %537 = vmatmul.f32.gmra.mxu0 %v2581_v11  ;;  %v2796_v10 = vld [vmem:[%s2527_s26] sm:$0xff] }
  0xdc   : > { %584 = vmatmul.f32.gmra.mxu1 %v2556_v4  ;;  %628 = vmatmul.f32.gmra.mxu2 %v2559_v5 }
  0xdd   : > { %672 = vmatmul.f32.gmra.mxu3 %v2562_v6  ;;  %540 = vmatmul.f32.gmra.mxu0 %v2565_v7 }
  0xe4   : > { %587 = vmatmul.f32.gmra.mxu1 %v2540_v0  ;;  %631 = vmatmul.f32.gmra.mxu2 %v2543_v1 }
  0xe5   : > { %675 = vmatmul.f32.gmra.mxu3 %v2546_v2  ;;  %543 = vmatmul.f32.gmra.mxu0 %v2551_v3 }
  0xec   : > { %1850 = vmatmul.msk.f32.vlgmr.msrb.gmra.mxu1 %vm679_vm0, %v2756_v36  ;;  %1851 = vmatmul.msk.f32.vlgmr.msrb.gmra.mxu2 %vm679_vm0, %v2756_v36 }
  0xed   : > { %1852 = vmatmul.msk.f32.vlgmr.msrb.gmra.mxu3 %vm679_vm0, %v2756_v36  ;;  %1849 = vmatmul.msk.f32.vlgmr.msrb.gmra.mxu0 %vm679_vm0, %v2756_v36 }
 0x120   : > { %v2766_v37 = vpop.f32.mrf.mxu1 }
 0x122   : > { %v2768_v38 = vpop.f32.mrf.mxu0 }
 0x126   : > { %v2770_v39 = vpop.f32.mrf.mxu2 }
 0x127   : > { %v2772_v40 = vpop.f32.mrf.mxu3 }
 0x129   : > { %v2774_v41 = vpop.f32.mrf.mxu1 }
 0x12a   : > { %v2776_v42 = vpop.f32.mrf.mxu0 }
 0x12f   : > { %v2778_v43 = vpop.f32.mrf.mxu2 }
 0x130   : > { %v2780_v44 = vpop.f32.mrf.mxu3 }
 0x131   : > { %v570_v45 = vpop.f32.mrf.mxu1 }
 0x132   : > { %v526_v46 = vpop.f32.mrf.mxu0 }
 0x137   : > { %v2782_v47 = vpop.f32.mrf.mxu2 }
 0x138   : > { %v2784_v48 = vpop.f32.mrf.mxu3 }
 0x139   : > { %v573_v49 = vpop.f32.mrf.mxu1 }
 0x13a   : > { %v529_v50 = vpop.f32.mrf.mxu0 }
 0x13f   : > { %v2786_v51 = vpop.f32.mrf.mxu2 }
 0x140   : > { %v2788_v52 = vpop.f32.mrf.mxu3 }
 0x141   : > { %v576_v53 = vpop.f32.mrf.mxu1 }
 0x142   : > { %v532_v54 = vpop.f32.mrf.mxu0 }
 0x143   : > { %v577_v2 = vadd.f32 %v576_v53, %v532_v54 }
 0x147   : > { %v620_v55 = vpop.f32.mrf.mxu2 }
 0x148   : > { %v2790_v56 = vpop.f32.mrf.mxu3 }
 0x149   : > { %v579_v57 = vpop.f32.mrf.mxu1 }
 0x14a   : > { %v535_v58 = vpop.f32.mrf.mxu0 }
 0x14f   : > { %v623_v59 = vpop.f32.mrf.mxu2 }
 0x150   : > { %v667_v60 = vpop.f32.mrf.mxu3 }
 0x151   : > { %v582_v61 = vpop.f32.mrf.mxu1 }
 0x152   : > { %v538_v62 = vpop.f32.mrf.mxu0 }
 0x153   : > { %v583_v24 = vadd.f32 %v582_v61, %v538_v62  ;;  %v2811_v61 = vld [vmem:[%s2527_s26 + $0x10] sm:$0xff] }
 0x157   : > { %v626_v63 = vpop.f32.mrf.mxu2 }
 0x158   : > { %v670_v36 = vpop.f32.mrf.mxu3  ;;  %v627_v30 = vadd.f32 %v626_v63, %v583_v24  ;;  %v2824_v24 = vld [vmem:[%s2520_s22 + $0x18] sm:$0xff] }
 0x159   : > { %v585_v1 = vpop.f32.mrf.mxu1 }
 0x15a   : > { %v541_v5 = vpop.f32.mrf.mxu0  ;;  %v2826_v53 = vadd.f32 %v670_v36, %v627_v30  ;;  %v565_v30 = vadd.f32 %v2766_v37, %v2768_v38 }
 0x15b   : > { %v586_v18 = vadd.f32 %v585_v1, %v541_v5 }
 0x15c   : > { %3314 = vst [vmem:[#allocation54_spill] sm:$0xff] %v2826_v53 }
 0x15f   : > { %v629_v9 = vpop.f32.mrf.mxu2 }
 0x160   : > { %v673_v13 = vpop.f32.mrf.mxu3  ;;  %v630_v1 = vadd.f32 %v629_v9, %v586_v18 }
 0x161   : > { %v588_v17 = vpop.f32.mrf.mxu1 }
 0x162   : > { %v544_v21 = vpop.f32.mrf.mxu0  ;;  %v2816_v9 = vadd.f32 %v673_v13, %v630_v1  ;;  %v3327_v1 = vld [vmem:[#allocation42_spill] sm:$0xff] }
 0x163   : > { %v589_v22 = vadd.f32 %v588_v17, %v544_v21  ;;  %v580_v17 = vadd.f32 %v579_v57, %v535_v58 }
 0x164   : > { %3313 = vst [vmem:[#allocation53_spill] sm:$0xff] %v2816_v9 }
 0x165   : > { %v624_v57 = vadd.f32 %v623_v59, %v580_v17  ;;  %v568_v59 = vadd.f32 %v2774_v41, %v2776_v42  ;;  %v3326_v17 = vld [vmem:[#allocation28_spill] sm:$0xff] }
 0x167   : > { %v632_v26 = vpop.f32.mrf.mxu2 }
 0x168   : > { %v676_v25 = vpop.f32.mrf.mxu3  ;;  %v633_v20 = vadd.f32 %v632_v26, %v589_v22 }
 0x169   : > { %v720_v6 = vpop.f32.mrf.mxu1 }
 0x16a   : > { %v764_v27 = vmul.f32 %v720_v6, %v2793_v14  ;;  %v700_v19 = vpop.f32.mrf.mxu0  ;;  %v2807_v22 = vadd.f32 %v676_v25, %v633_v20  ;;  %v574_v6 = vadd.f32 %v573_v49, %v529_v50  ;;  %v2814_v14 = vld [vmem:[%s2527_s26 + $0x18] sm:$0xff]  ;;  %v571_v49 = vadd.f32 %v570_v45, %v526_v46 }
 0x16b   : > { %v763_v5 = vmul.f32 %v700_v19, %v2796_v10  ;;  %v2819_v19 = vld [vmem:[%s2520_s22 + $0x10] sm:$0xff]  ;;  %v621_v50 = vadd.f32 %v620_v55, %v577_v2  ;;  %v2836_v45 = vadd.f32 %v667_v60, %v624_v57  ;;  %v3324_v60 = vld [vmem:[#allocation35_spill] sm:$0xff]  ;;  %v3333_v57 = vld [vmem:[#allocation45_spill] sm:$0xff] }
 0x16c   : > { %v768_v21 = vsub.f32 %v764_v27, %v2799_v23  ;;  %v618_v63 = vadd.f32 %v2786_v51, %v574_v6  ;;  %v615_v46 = vadd.f32 %v2782_v47, %v571_v49  ;;  %v612_v51 = vadd.f32 %v2778_v43, %v568_v59  ;;  %v3331_v6 = vld [vmem:[#allocation44_spill] sm:$0xff] }
 0x16d   : > { %v767_v26 = vsub.f32 %v763_v5, %v2803_v16  ;;  %3315 = vst [vmem:[#allocation55_spill] sm:$0xff] %v2836_v45  ;;  %v2844_v55 = vadd.f32 %v2790_v56, %v621_v50  ;;  %v609_v47 = vadd.f32 %v2770_v39, %v565_v30  ;;  %v3328_v5 = vld [vmem:[#allocation39_spill] sm:$0xff]  ;;  %v3338_v49 = vld [vmem:[#allocation32_spill] sm:$0xff]  ;;  %v3339_v50 = vld [vmem:[#allocation29_spill] sm:$0xff] }
 0x16e   : > { %v772_v62 = vmul.f32 %v768_v21, %v768_v21  ;;  %846 = vmatpush.xpose.msra.mxu1 %v768_v21  ;;  %v2851_v37 = vadd.f32 %v2788_v52, %v618_v63  ;;  %v2859_v56 = vadd.f32 %v2784_v48, %v615_v46  ;;  %v2865_v43 = vadd.f32 %v2780_v44, %v612_v51  ;;  %v3321_v44 = vld [vmem:[#allocation48_spill] sm:$0xff]  ;;  %v3322_v48 = vld [vmem:[#allocation26_spill] sm:$0xff]  ;;  %v3329_v21 = vld [vmem:[#allocation43_spill] sm:$0xff] }
 0x16f   : > { %v771_v18 = vmul.f32 %v767_v26, %v767_v26  ;;  %v740_v27 = vpop.f32.mrf.mxu2  ;;  %802 = vmatpush.xpose.msra.mxu0 %v767_v26  ;;  %3316 = vst [vmem:[#allocation56_spill] sm:$0xff] %v2844_v55  ;;  %v2872_v39 = vadd.f32 %v2772_v40, %v609_v47  ;;  %v3323_v52 = vld [vmem:[#allocation38_spill] sm:$0xff] }
 0x170   : > { %v765_v20 = vmul.f32 %v740_v27, %v2811_v61  ;;  %v760_v25 = vpop.f32.mrf.mxu3  ;;  %3317 = vst [vmem:[#allocation57_spill] sm:$0xff] %v2851_v37  ;;  %v3325_v40 = vld [vmem:[#allocation46_spill] sm:$0xff]  ;;  %v3335_v27 = vld [vmem:[#allocation41_spill] sm:$0xff] }
 0x171   : > { %v766_v54 = vmul.f32 %v760_v25, %v2814_v14  ;;  %v775_v58 = vadd.f32 %v772_v62, %v771_v18  ;;  %847 = vmatmul.f32.vlgmr.msra.gmra.mxu1 %v2668_v32  ;;  %3318 = vst [vmem:[#allocation58_spill] sm:$0xff] %v2859_v56  ;;  %v3330_v26 = vld [vmem:[#allocation30_spill] sm:$0xff]  ;;  %v3332_v62 = vld [vmem:[#allocation33_spill] sm:$0xff]  ;;  %v3337_v25 = vld [vmem:[#allocation36_spill] sm:$0xff] }
 0x172   : > { %1041 = vmatpush.msrb.mxu1 %v2807_v22  ;;  %v769_v13 = vsub.f32 %v765_v20, %v2819_v19  ;;  %803 = vmatmul.f32.vlgmr.msra.gmra.mxu0 %v2677_v35  ;;  %3319 = vst [vmem:[#allocation59_spill] sm:$0xff] %v2865_v43  ;;  %v3334_v18 = vld [vmem:[#allocation37_spill] sm:$0xff]  ;;  %v3336_v20 = vld [vmem:[#allocation40_spill] sm:$0xff] }
 0x173   : > { %v770_v2 = vsub.f32 %v766_v54, %v2824_v24  ;;  %3320 = vst [vmem:[#allocation60_spill] sm:$0xff] %v2872_v39  ;;  %v3340_v54 = vld [vmem:[#allocation27_spill] sm:$0xff] }
 0x174   : > { %1042 = vmatpush.msrb.mxu1 %v2816_v9  ;;  %890 = vmatpush.xpose.msra.mxu2 %v769_v13  ;;  %v773_v36 = vmul.f32 %v769_v13, %v769_v13  ;;  %v3341_v13 = vld [vmem:[#allocation25_spill] sm:$0xff] }
 0x175   : > { %934 = vmatpush.xpose.msra.mxu3 %v770_v2  ;;  %v774_v41 = vmul.f32 %v770_v2, %v770_v2 }
 0x176   : > { %1043 = vmatpush.msrb.mxu1 %v2826_v53  ;;  %v776_v42 = vadd.f32 %v775_v58, %v773_v36 }
 0x177   : > { %891 = vmatmul.f32.vlgmr.msra.gmra.mxu2 %v2671_v33 }
 0x178   : > { %1044 = vmatpush.msrb.mxu1 %v2836_v45  ;;  %1102 = vmatpush.msrb.mxu2 %v2551_v3  ;;  %v777_v38 = vadd.f32 %v776_v42, %v774_v41 }
 0x179   : > { %1122 = vmatpush.msrb.mxu3 %v2540_v0  ;;  %850 = vmatmul.f32.gmra.mxu1 %v2652_v28 }
 0x17a   : > { %1045 = vmatpush.msrb.mxu1 %v2844_v55  ;;  %935 = vmatmul.f32.vlgmr.msra.gmra.mxu3 %v2674_v34 }
 0x17b   : > { %1103 = vmatpush.msrb.mxu2 %v2565_v7  ;;  %1123 = vmatpush.msrb.mxu3 %v2556_v4 }
 0x17c   : > { %1046 = vmatpush.msrb.mxu1 %v2851_v37  ;;  %778 = vadd.xlane.f32.xlu0 %v777_v38 }
 0x17d   : > { %806 = vmatmul.f32.gmra.mxu0 %v2661_v31  ;;  %1104 = vmatpush.msrb.mxu2 %v2581_v11 }
 0x17e   : > { %1047 = vmatpush.msrb.mxu1 %v2859_v56  ;;  %1124 = vmatpush.msrb.mxu3 %v2572_v8 }
 0x17f   : > { %1105 = vmatpush.msrb.mxu2 %v2597_v15 }
 0x180   : > { %1048 = vmatpush.msrb.mxu1 %v2865_v43  ;;  %1125 = vmatpush.msrb.mxu3 %v2588_v12 }
 0x181   : > { %894 = vmatmul.f32.gmra.mxu2 %v2655_v29  ;;  %853 = vmatmul.f32.gmra.mxu1 %v3329_v21 }
 0x182   : > { %1049 = vmatpush.msrb.mxu1 %v2872_v39  ;;  %938 = vmatmul.f32.gmra.mxu3 %v3321_v44 }
 0x183   : > { %1106 = vmatpush.msrb.mxu2 %v3323_v52  ;;  %1126 = vmatpush.msrb.mxu3 %v3324_v60 }
 0x184   : > { %1162 = vmatpush.msra.mxu1 %v3322_v48 }
 0x185   : > { %809 = vmatmul.f32.gmra.mxu0 %v3325_v40  ;;  %1107 = vmatpush.msrb.mxu2 %v3327_v1 }
 0x186   : > { %1163 = vmatpush.msra.mxu1 %v3326_v17  ;;  %1127 = vmatpush.msrb.mxu3 %v3328_v5 }
 0x187   : > { %1108 = vmatpush.msrb.mxu2 %v3325_v40 }
 0x188   : > { %1164 = vmatpush.msra.mxu1 %v3330_v26  ;;  %1128 = vmatpush.msrb.mxu3 %v3329_v21 }
 0x189   : > { %897 = vmatmul.f32.gmra.mxu2 %v3331_v6  ;;  %856 = vmatmul.f32.gmra.mxu1 %v3328_v5 }
 0x18a   : > { %1165 = vmatpush.msra.mxu1 %v3332_v62  ;;  %941 = vmatmul.f32.gmra.mxu3 %v3333_v57 }
 0x18b   : > { %1109 = vmatpush.msrb.mxu2 %v2661_v31  ;;  %1129 = vmatpush.msrb.mxu3 %v2652_v28 }
 0x18c   : > { %1166 = vmatpush.msra.mxu1 %v3334_v18 }
 0x18d   : > { %812 = vmatmul.f32.gmra.mxu0 %v3327_v1  ;;  %1110 = vmatpush.msrb.mxu2 %v2677_v35 }
 0x18e   : > { %1167 = vmatpush.msra.mxu1 %v3335_v27  ;;  %1130 = vmatpush.msrb.mxu3 %v2668_v32 }
 0x190   : > { %1168 = vmatpush.msra.mxu1 %v3333_v57 }
 0x191   : > { %900 = vmatmul.f32.gmra.mxu2 %v3336_v20  ;;  %859 = vmatmul.f32.gmra.mxu1 %v3324_v60 }
 0x192   : > { %1169 = vmatpush.msra.mxu1 %v3321_v44  ;;  %944 = vmatmul.f32.gmra.mxu3 %v3335_v27 }
 0x194   : > { %1170 = vmatpush.msra.mxu1 %v2674_v34 }
 0x195   : > { %815 = vmatmul.f32.gmra.mxu0 %v3323_v52 }
 0x199   : > { %903 = vmatmul.f32.gmra.mxu2 %v3337_v25  ;;  %862 = vmatmul.f32.gmra.mxu1 %v2588_v12 }
 0x19a   : > { %947 = vmatmul.f32.gmra.mxu3 %v3334_v18 }
 0x19d   : > { %818 = vmatmul.f32.gmra.mxu0 %v2597_v15 }
 0x1a1   : > { %906 = vmatmul.f32.gmra.mxu2 %v3338_v49  ;;  %865 = vmatmul.f32.gmra.mxu1 %v2572_v8 }
 0x1a2   : > { %950 = vmatmul.f32.gmra.mxu3 %v3332_v62 }
 0x1a5   : > { %821 = vmatmul.f32.gmra.mxu0 %v2581_v11 }
 0x1a9   : > { %909 = vmatmul.f32.gmra.mxu2 %v3339_v50  ;;  %868 = vmatmul.f32.gmra.mxu1 %v2556_v4 }
 0x1aa   : > { %953 = vmatmul.f32.gmra.mxu3 %v3330_v26 }
 0x1ad   : > { %824 = vmatmul.f32.gmra.mxu0 %v2565_v7 }
 0x1b1   : > { %912 = vmatmul.f32.gmra.mxu2 %v3340_v54  ;;  %871 = vmatmul.f32.gmra.mxu1 %v2540_v0 }
 0x1b2   : > { %956 = vmatmul.f32.gmra.mxu3 %v3326_v17 }
 0x1b5   : > { %827 = vmatmul.f32.gmra.mxu0 %v2551_v3 }
 0x1b9   : > { %915 = vmatmul.f32.gmra.mxu2 %v3341_v13 }
 0x1ba   : > { %959 = vmatmul.f32.gmra.mxu3 %v3322_v48 }
 0x1ee   : > { %v848_v2 = vpop.f32.mrf.mxu1 }
 0x1ef   : > { %v779_v58 = vpop.xlane.xlu0 %778  ;;  %v804_v63 = vpop.f32.mrf.mxu0 }
 0x1f0   : > { %v780_v59 = vrot.slane %v779_v58, 4  ;;  %v849_v36 = vadd.f32 %v848_v2, %v804_v63 }
 0x1f2   : > { %v781_v30 = vadd.f32 %v780_v59, %v779_v58 }
 0x1f4   : > { %v782_v46 = vrot.slane %v781_v30, 2 }
 0x1f6   : > { %v783_v41 = vadd.f32 %v782_v46, %v781_v30  ;;  %v851_v47 = vpop.f32.mrf.mxu1 }
 0x1f8   : > { %v784_v42 = vrot.slane %v783_v41, 1 }
 0x1fa   : > { %v807_v51 = vpop.f32.mrf.mxu0  ;;  %v785_v38 = vadd.f32 %v784_v42, %v783_v41  ;;  %v892_v17 = vpop.f32.mrf.mxu2 }
 0x1fb   : > { %v852_v26 = vadd.f32 %v851_v47, %v807_v51  ;;  %v893_v62 = vadd.f32 %v892_v17, %v849_v36 }
 0x1fc   : > { %1895 = vpush %v785_v38 }
 0x1fd   : > { %v936_v18 = vpop.f32.mrf.mxu3 }
 0x1fe   : > { %v2927_v27 = vadd.f32 %v936_v18, %v893_v62  ;;  %v854_v39 = vpop.f32.mrf.mxu1 }
 0x202   : > { %v810_v48 = vpop.f32.mrf.mxu0 }
 0x203   : > { %v855_v43 = vadd.f32 %v854_v39, %v810_v48 }
 0x204   : > { %v895_v21 = vpop.f32.mrf.mxu2 }
 0x205   : > { %v896_v57 = vadd.f32 %v895_v21, %v852_v26  ;;  %v939_v58 = vpop.f32.mrf.mxu3 }
 0x206   : > { %v857_v2 = vpop.f32.mrf.mxu1 }
 0x207   : > { %v940_v59 = vadd.f32 %v939_v58, %v896_v57 }
 0x20a   : > { %v813_v63 = vpop.f32.mrf.mxu0 }
 0x20c   : > { %v898_v30 = vpop.f32.mrf.mxu2 }
 0x20d   : > { %v899_v46 = vadd.f32 %v898_v30, %v855_v43  ;;  %v942_v41 = vpop.f32.mrf.mxu3 }
 0x20e   : > { %v860_v56 = vpop.f32.mrf.mxu1 }
 0x20f   : > { %v943_v42 = vadd.f32 %v942_v41, %v899_v46 }
 0x212   : > { %v816_v38 = vpop.f32.mrf.mxu0 }
 0x213   : > { %v861_v15 = vadd.f32 %v860_v56, %v816_v38 }
 0x214   : > { %v901_v51 = vpop.f32.mrf.mxu2 }
 0x215   : > { %v945_v36 = vpop.f32.mrf.mxu3 }
 0x216   : > { %v863_v17 = vpop.f32.mrf.mxu1 }
 0x21a   : > { %v819_v47 = vpop.f32.mrf.mxu0 }
 0x21b   : > { %v864_v44 = vadd.f32 %v863_v17, %v819_v47 }
 0x21c   : > { %v904_v62 = vpop.f32.mrf.mxu2 }
 0x21d   : > { %v948_v18 = vpop.f32.mrf.mxu3 }
 0x21e   : > { %v866_v5 = vpop.f32.mrf.mxu1 }
 0x222   : > { %v822_v40 = vpop.f32.mrf.mxu0 }
 0x223   : > { %v867_v60 = vadd.f32 %v866_v5, %v822_v40 }
 0x224   : > { %v907_v39 = vpop.f32.mrf.mxu2 }
 0x225   : > { %v951_v21 = vpop.f32.mrf.mxu3  ;;  %v908_v9 = vadd.f32 %v907_v39, %v864_v44 }
 0x226   : > { %v869_v48 = vpop.f32.mrf.mxu1 }
 0x22a   : > { %v825_v26 = vpop.f32.mrf.mxu0 }
 0x22b   : > { %v870_v28 = vadd.f32 %v869_v48, %v825_v26  ;;  %v858_v26 = vadd.f32 %v857_v2, %v813_v63  ;;  %v905_v48 = vadd.f32 %v904_v62, %v861_v15  ;;  %v2954_v15 = vstv %s454_s11 }
 0x22c   : > { %v910_v57 = vpop.f32.mrf.mxu2  ;;  %v2968_v62 = vstv %s1054_s14  ;;  %s2216_s14 = scalar_lea.hbm %s3182_s6, 32 }
 0x22d   : > { %v954_v58 = vpop.f32.mrf.mxu3  ;;  %v911_v53 = vadd.f32 %v910_v57, %v867_v60  ;;  %v902_v40 = vadd.f32 %v901_v51, %v858_v26  ;;  %s2964_s5 = spop %1895 }
 0x22e   : > { %v872_v46 = vpop.f32.mrf.mxu1 }
 0x22f   : > { %v955_v32 = vadd.f32 %v954_v58, %v911_v53 }
 0x232   : > { %v828_v30 = vpop.f32.mrf.mxu0 }
 0x233   : > { %v873_v41 = vadd.f32 %v872_v46, %v828_v30 }
 0x234   : > { %v913_v37 = vpop.f32.mrf.mxu2 }
 0x235   : > { %v957_v43 = vpop.f32.mrf.mxu3  ;;  %v914_v45 = vadd.f32 %v913_v37, %v870_v28  ;;  %v949_v28 = vadd.f32 %v948_v18, %v905_v48 }
 0x237   : > { %v958_v12 = vadd.f32 %v957_v43, %v914_v45 }
 0x23c   : > { %v916_v31 = vpop.f32.mrf.mxu2 }
 0x23d   : > { %v917_v55 = vadd.f32 %v916_v31, %v873_v41  ;;  %v960_v1 = vpop.f32.mrf.mxu3  ;;  %v952_v31 = vadd.f32 %v951_v21, %v908_v9  ;;  %v3342_v9 = vld [vmem:[#allocation51_spill] sm:$0xff] }
 0x23e   : > { %v1017_v53 = vmul.f32 %v2954_v15, %v3342_v9 }
 0x23f   : > { %v961_v52 = vadd.f32 %v960_v1, %v917_v55  ;;  %v946_v55 = vadd.f32 %v945_v36, %v902_v40 }
 0x241   : > { %1853 = vmatpush.xpose.msk.msrb.mxu0 %vm963_vm1, %v961_v52 }
 0x245   : > { %1854 = vmatpush.xpose.msk.msrb.mxu0 %vm963_vm1, %v958_v12  ;;  %v2939_v12 = vld [vmem:[#allocation12] sm:$0xff] }
 0x249   : > { %1855 = vmatpush.xpose.msk.msrb.mxu0 %vm963_vm1, %v955_v32  ;;  %v1014_v32 = vstv %s2952_s18 }
 0x24d   : > { %1856 = vmatpush.xpose.msk.msrb.mxu0 %vm963_vm1, %v952_v31 }
 0x251   : > { %1857 = vmatpush.xpose.msk.msrb.mxu0 %vm963_vm1, %v949_v28 }
 0x255   : > { %1858 = vmatpush.xpose.msk.msrb.mxu0 %vm963_vm1, %v946_v55 }
 0x259   : > { %1859 = vmatpush.xpose.msk.msrb.mxu0 %vm963_vm1, %v943_v42 }
 0x25d   : > { %1860 = vmatpush.xpose.msk.msrb.mxu0 %vm963_vm1, %v940_v59 }
 0x261   : > { %1861 = vmatpush.xpose.msk.msrb.mxu0 %vm963_vm1, %v2927_v27 }
 0x264   : > { %1862 = vmatmul.msk.f32.vlgmr.msrb.gmra.mxu0 %vm963_vm1, %v2939_v12 }
 0x265   : > { %1142 = vmatpush.msra.mxu0 %v3341_v13 }
 0x267   : > { %1143 = vmatpush.msra.mxu0 %v3340_v54 }
 0x269   : > { %1144 = vmatpush.msra.mxu0 %v3339_v50 }
 0x26b   : > { %1145 = vmatpush.msra.mxu0 %v3338_v49 }
 0x26d   : > { %1146 = vmatpush.msra.mxu0 %v3337_v25 }
 0x26f   : > { %1147 = vmatpush.msra.mxu0 %v3336_v20 }
 0x271   : > { %1148 = vmatpush.msra.mxu0 %v3331_v6 }
 0x273   : > { %1149 = vmatpush.msra.mxu0 %v2655_v29 }
 0x275   : > { %1150 = vmatpush.msra.mxu0 %v2671_v33 }
 0x2e1   : > { %v1011_v45 = vpop.f32.mrf.mxu0 }
 0x2e2   : > { %v1015_v37 = vmul.f32 %v1014_v32, %v1011_v45 }
 0x2e4   : > { %v1018_v56 = vadd.f32 %v1017_v53, %v1015_v37  ;;  %v1087_v53 = vstv %s2972_s15 }
 0x2e6   : > { %1863 = vmatmul.msk.f32.vlgmr.msrb.gmra.mxu1 %vm679_vm0, %v1018_v56  ;;  %v1019_v44 = vmul.f32 %v1018_v56, %v1018_v56 }
 0x2e8   : > { %v1020_v52 = vsel %vm679_vm0, %v1019_v44, 0.0 }
 0x2e9   : > { %1021 = vadd.xlane.f32.xlu0 %v1020_v52 }
 0x35c   : > { %v1022_v60 = vpop.xlane.xlu0 %1021 }
 0x35d   : > { %v1023_v1 = vrot.slane %v1022_v60, 4 }
 0x35f   : > { %v1024_v5 = vadd.f32 %v1023_v1, %v1022_v60 }
 0x361   : > { %v1025_v27 = vrot.slane %v1024_v5, 2 }
 0x363   : > { %v1051_v25 = vpop.f32.mrf.mxu1  ;;  %v1026_v49 = vadd.f32 %v1025_v27, %v1024_v5 }
 0x364   : > { %v1055_v50 = vmul.f32 %v1051_v25, %v1018_v56 }
 0x365   : > { %v1027_v54 = vrot.slane %v1026_v49, 1 }
 0x366   : > { %v1056_v13 = vsel %vm679_vm0, %v1055_v50, 0.0 }
 0x367   : > { %1057 = vadd.xlane.f32.xlu1 %v1056_v13  ;;  %v1028_v59 = vadd.f32 %v1027_v54, %v1026_v49  ;;  %v3343_v54 = vld [vmem:[#allocation52_spill] sm:$0xff] }
 0x369   : > { %1897 = vpush %v1028_v59  ;;  %v3348_v59 = vld [vmem:[#allocation54_spill] sm:$0xff] }
 0x39a   : > { %s1898_s8 = spop %1897 }
 0x39b   : > { %v1030_v17 = vstv %s1898_s8 }
 0x39c   : > { %v1069_v39 = vmul.f32 %v1030_v17, %v2954_v15 }
 0x3da   : > { %v1058_v63 = vpop.xlane.xlu1 %1057 }
 0x3db   : > { %v1059_v2 = vrot.slane %v1058_v63, 4 }
 0x3dd   : > { %v1060_v42 = vadd.f32 %v1059_v2, %v1058_v63  ;;  %v3351_v63 = vld [vmem:[#allocation55_spill] sm:$0xff] }
 0x3de   : > { %v3352_v2 = vld [vmem:[#allocation35_spill] sm:$0xff] }
 0x3df   : > { %v1061_v38 = vrot.slane %v1060_v42, 2 }
 0x3e1   : > { %v1062_v51 = vadd.f32 %v1061_v38, %v1060_v42  ;;  %v3353_v42 = vld [vmem:[#allocation42_spill] sm:$0xff]  ;;  %v3354_v38 = vld [vmem:[#allocation56_spill] sm:$0xff] }
 0x3e3   : > { %v1063_v36 = vrot.slane %v1062_v51, 1 }
 0x3e5   : > { %v1064_v47 = vadd.f32 %v1063_v36, %v1062_v51  ;;  %v3355_v51 = vld [vmem:[#allocation49_spill] sm:$0xff]  ;;  %v3356_v36 = vld [vmem:[#allocation47_spill] sm:$0xff] }
 0x3e7   : > { %1899 = vpush %v1064_v47  ;;  %v3357_v47 = vld [vmem:[#allocation57_spill] sm:$0xff] }
 0x418   : > { %s1900_s16 = spop %1899 }
 0x419   : > { %v1066_v18 = vstv %s1900_s16 }
 0x41a   : > { %v1068_v21 = vmul.f32 %v2968_v62, %v1066_v18  ;;  %v3360_v18 = vld [vmem:[#allocation58_spill] sm:$0xff] }
 0x41c   : > { %v1070_v57 = vadd.f32 %v1069_v39, %v1068_v21  ;;  %v3361_v39 = vld [vmem:[#allocation45_spill] sm:$0xff]  ;;  %v3362_v21 = vld [vmem:[#allocation59_spill] sm:$0xff] }
 0x41e   : > { %v1071_v58 = vmax.f32 %v1070_v57, 1e-08  ;;  %v3363_v57 = vld [vmem:[#allocation43_spill] sm:$0xff] }
 0x420   : > { %1995 = vrcp.f32 %v1071_v58  ;;  %v1083_v41 = vand.u32 2147483648, %v1071_v58  ;;  %v1081_v48 = vand.u32 2147483647, %v1071_v58  ;;  %vm1077_vm3 = vweird.f32 %v1071_v58 }
 0x422   : > { %v1084_v40 = vor.u32 1.1754944e-38, %v1083_v41  ;;  %vm1082_vm5 = vcmp.eq.f32.partialorder %v1081_v48, 8.507059e+37  ;;  %v2003_v41 = vld [vmem:[%s2512_s21 + $0x98] sm:$0xff]  ;;  %v2006_v48 = vld [vmem:[%s2512_s21 + $0x88] sm:$0xff] }
 0x426   : > { %v1996_v43 = vpop.eup %1995 }
 0x427   : > { %v1073_v30 = vmul.f32 %v1996_v43, %v1071_v58  ;;  %vm1078_vm2 = vweird.f32 %v1996_v43  ;;  %v3364_v58 = vld [vmem:[#allocation60_spill] sm:$0xff] }
 0x428   : > { %vm1079_vm4 = vmor %vm1077_vm3, %vm1078_vm2 }
 0x429   : > { %v1074_v46 = vsub.f32 1.0, %v1073_v30  ;;  %v3365_v30 = vld [vmem:[#allocation41_spill] sm:$0xff] }
 0x42b   : > { %v1075_v26 = vmul.f32 %v1996_v43, %v1074_v46  ;;  %v2002_v46 = vld [vmem:[%s2512_s21 + $0xb8] sm:$0xff] }
 0x42d   : > { %v1076_v31 = vadd.f32 %v1996_v43, %v1075_v26  ;;  %v3051_v26 = vld [vmem:[%s2512_s21 + $0x90] sm:$0xff] }
 0x42f   : > { %v1080_v28 = vsel %vm1079_vm4, %v1996_v43, %v1076_v31  ;;  %v2000_v43 = vld [vmem:[%s2512_s21 + $0xf8] sm:$0xff]  ;;  %v3061_v31 = vld [vmem:[%s2512_s21 + $0xb0] sm:$0xff] }
 0x430   : > { %v1085_v55 = vsel %vm1082_vm5, %v1084_v40, %v1080_v28  ;;  %v2008_v40 = vld [vmem:[%s2512_s21 + $0xa0] sm:$0xff]  ;;  %v2009_v28 = vld [vmem:[%s2512_s21 + $0xa8] sm:$0xff] }
 0x431   : > { %v1086_v45 = vmul.f32 %v1085_v55, %v1030_v17  ;;  %v3359_v17 = vld [vmem:[#allocation46_spill] sm:$0xff]  ;;  %v3067_v55 = vld [vmem:[%s2512_s21 + $0xd0] sm:$0xff] }
 0x433   : > { %v1088_v37 = vmul.f32 %v1087_v53, %v1086_v45  ;;  %v2011_v45 = vld [vmem:[%s2512_s21 + $0xc0] sm:$0xff] }
 0x435   : > { %v1089_v44 = vmul.f32 %v1088_v37, %v1018_v56  ;;  %v3073_v37 = vld [vmem:[%s2512_s21 + $0xf0] sm:$0xff] }
 0x437   : > { %v2979_v52 = vsub.f32 %v3342_v9, %v1089_v44  ;;  %v2014_v44 = vld [vmem:[%s2512_s21 + $0xe0] sm:$0xff] }
 0x439   : > { %1864 = vmatmul.msk.f32.vlgmr.msrb.gmra.mxu2 %vm679_vm0, %v2979_v52  ;;  %1865 = vmatmul.msk.f32.vlgmr.msrb.gmra.mxu3 %vm679_vm0, %v2979_v52  ;;  %1091 = vst.msk [vmem:[%s2985_s9] sm:$0xff] %vm679_vm0, %v2979_v52 }
 0x43a   : > { %1866 = vmatmul.msk.f32.vlgmr.msra.gmra.mxu0 %vm679_vm0, %v2979_v52  ;;  %1867 = vmatmul.msk.f32.vlgmr.msra.gmra.mxu1 %vm679_vm0, %v2979_v52 }
 0x4b7   : > { %v1152_v9 = vpop.f32.mrf.mxu0  ;;  %v1172_v56 = vpop.f32.mrf.mxu1 }
 0x4b8   : > { %v1177_v60 = vmul.f32 %v1152_v9, %v2811_v61  ;;  %v1178_v1 = vmul.f32 %v1172_v56, %v2814_v14  ;;  %v2015_v9 = vld [vmem:[%s2512_s21 + $0xe8] sm:$0xff]  ;;  %v3079_v56 = vld [vmem:[%s2512_s21 + $0x110] sm:$0xff] }
 0x4ba   : > { %v1181_v5 = vsub.f32 %v1177_v60, %v2819_v19  ;;  %v1182_v27 = vsub.f32 %v1178_v1, %v2824_v24  ;;  %v3347_v24 = vld [vmem:[#allocation31_spill] sm:$0xff]  ;;  %v2017_v60 = vld [vmem:[%s2512_s21 + $0x100] sm:$0xff] }
 0x4bb   : > { %v2018_v1 = vld [vmem:[%s2512_s21 + $0x108] sm:$0xff] }
 0x4bc   : > { %1302 = vmatpush.xpose.msrb.mxu0 %v1181_v5  ;;  %1346 = vmatpush.xpose.msrb.mxu1 %v1182_v27  ;;  %v1112_v25 = vpop.f32.mrf.mxu2  ;;  %v1132_v49 = vpop.f32.mrf.mxu3 }
 0x4bd   : > { %v1175_v50 = vmul.f32 %v1112_v25, %v2796_v10  ;;  %v1176_v13 = vmul.f32 %v1132_v49, %v3343_v54 }
 0x4bf   : > { %v1179_v61 = vsub.f32 %v1175_v50, %v2803_v16  ;;  %v1180_v14 = vsub.f32 %v1176_v13, %v2799_v23  ;;  %1303 = vmatmul.f32.vlgmr.msrb.gmra.mxu0 %v2671_v33  ;;  %1347 = vmatmul.f32.vlgmr.msrb.gmra.mxu1 %v2674_v34  ;;  %v3344_v16 = vld [vmem:[#allocation50_spill] sm:$0xff]  ;;  %v3345_v23 = vld [vmem:[#allocation53_spill] sm:$0xff] }
 0x4c0   : > { %1506 = vmatpush.msra.mxu0 %v2551_v3  ;;  %1526 = vmatpush.msra.mxu1 %v2540_v0  ;;  %v1185_v0 = vmul.f32 %v1181_v5, %v1181_v5  ;;  %v3346_v33 = vld [vmem:[#allocation34_spill] sm:$0xff] }
 0x4c1   : > { %v1183_v19 = vmul.f32 %v1179_v61, %v1179_v61  ;;  %v1184_v10 = vmul.f32 %v1180_v14, %v1180_v14  ;;  %1214 = vmatpush.xpose.msra.mxu2 %v1179_v61  ;;  %1258 = vmatpush.xpose.msra.mxu3 %v1180_v14 }
 0x4c2   : > { %1507 = vmatpush.msra.mxu0 %v2565_v7  ;;  %1527 = vmatpush.msra.mxu1 %v2556_v4  ;;  %v1186_v7 = vmul.f32 %v1182_v27, %v1182_v27 }
 0x4c3   : > { %v1187_v3 = vadd.f32 %v1184_v10, %v1183_v19 }
 0x4c4   : > { %1508 = vmatpush.msra.mxu0 %v2581_v11  ;;  %1528 = vmatpush.msra.mxu1 %v2572_v8  ;;  %v3349_v11 = vld [vmem:[#allocation48_spill] sm:$0xff]  ;;  %v3350_v8 = vld [vmem:[#allocation38_spill] sm:$0xff] }
 0x4c5   : > { %1447 = vmatpush.msrb.mxu3 %v2807_v22  ;;  %1215 = vmatmul.f32.vlgmr.msra.gmra.mxu2 %v2677_v35  ;;  %v1188_v4 = vadd.f32 %v1187_v3, %v1185_v0 }
 0x4c6   : > { %1259 = vmatmul.f32.vlgmr.msra.gmra.mxu3 %v3344_v16  ;;  %1509 = vmatpush.msra.mxu0 %v3346_v33 }
 0x4c7   : > { %1448 = vmatpush.msrb.mxu3 %v3345_v23  ;;  %1529 = vmatpush.msra.mxu1 %v3347_v24  ;;  %v1189_v22 = vadd.f32 %v1188_v4, %v1186_v7 }
 0x4c8   : > { %1306 = vmatmul.f32.gmra.mxu0 %v2655_v29  ;;  %1350 = vmatmul.f32.gmra.mxu1 %v3349_v11  ;;  %v3358_v29 = vld [vmem:[#allocation39_spill] sm:$0xff] }
 0x4c9   : > { %1449 = vmatpush.msrb.mxu3 %v3348_v59  ;;  %1510 = vmatpush.msra.mxu0 %v3350_v8 }
 0x4ca   : > { %1190 = vadd.xlane.f32.xlu1 %v1189_v22  ;;  %1530 = vmatpush.msra.mxu1 %v3352_v2 }
 0x4cb   : > { %1450 = vmatpush.msrb.mxu3 %v3351_v63  ;;  %1511 = vmatpush.msra.mxu0 %v3353_v42 }
 0x4cc   : > { %1531 = vmatpush.msra.mxu1 %v3358_v29 }
 0x4cd   : > { %1451 = vmatpush.msrb.mxu3 %v3354_v38  ;;  %1218 = vmatmul.f32.gmra.mxu2 %v3355_v51 }
 0x4ce   : > { %1262 = vmatmul.f32.gmra.mxu3 %v3356_v36  ;;  %1512 = vmatpush.msra.mxu0 %v3359_v17 }
 0x4cf   : > { %1452 = vmatpush.msrb.mxu3 %v3357_v47  ;;  %1532 = vmatpush.msra.mxu1 %v3363_v57 }
 0x4d0   : > { %1309 = vmatmul.f32.gmra.mxu0 %v3331_v6  ;;  %1353 = vmatmul.f32.gmra.mxu1 %v3361_v39  ;;  %v1999_v6 = vld [vmem:[%s2512_s21 + $0x118] sm:$0xff] }
 0x4d1   : > { %1453 = vmatpush.msrb.mxu3 %v3360_v18  ;;  %1513 = vmatpush.msra.mxu0 %v3355_v51 }
 0x4d2   : > { %1533 = vmatpush.msra.mxu1 %v3356_v36 }
 0x4d3   : > { %1454 = vmatpush.msrb.mxu3 %v3362_v21  ;;  %1514 = vmatpush.msra.mxu0 %v2677_v35  ;;  %v2001_v35 = vld [vmem:[%s2512_s21 + $0xd8] sm:$0xff] }
 0x4d4   : > { %1534 = vmatpush.msra.mxu1 %v3344_v16 }
 0x4d5   : > { %1455 = vmatpush.msrb.mxu3 %v3364_v58  ;;  %1221 = vmatmul.f32.gmra.mxu2 %v3359_v17 }
 0x4d6   : > { %1265 = vmatmul.f32.gmra.mxu3 %v3363_v57 }
 0x4d7   : > { %1566 = vmatpush.msra.mxu3 %v1999_v6 }
 0x4d8   : > { %1312 = vmatmul.f32.gmra.mxu0 %v3336_v20  ;;  %1356 = vmatmul.f32.gmra.mxu1 %v3365_v30  ;;  %v2005_v20 = vld [vmem:[%s2512_s21 + $0x80] sm:$0xff] }
 0x4d9   : > { %1567 = vmatpush.msra.mxu3 %v2000_v43 }
 0x4db   : > { %1568 = vmatpush.msra.mxu3 %v2001_v35 }
 0x4dd   : > { %1569 = vmatpush.msra.mxu3 %v2002_v46  ;;  %1224 = vmatmul.f32.gmra.mxu2 %v3353_v42 }
 0x4de   : > { %1268 = vmatmul.f32.gmra.mxu3 %v3358_v29 }
 0x4df   : > { %1570 = vmatpush.msra.mxu3 %v2003_v41 }
 0x4e0   : > { %1315 = vmatmul.f32.gmra.mxu0 %v3051_v26  ;;  %1359 = vmatmul.f32.gmra.mxu1 %v2003_v41 }
 0x4e1   : > { %1571 = vmatpush.msra.mxu3 %v3365_v30 }
 0x4e3   : > { %1572 = vmatpush.msra.mxu3 %v3361_v39 }
 0x4e5   : > { %1573 = vmatpush.msra.mxu3 %v3349_v11  ;;  %1227 = vmatmul.f32.gmra.mxu2 %v2005_v20 }
 0x4e6   : > { %1271 = vmatmul.f32.gmra.mxu3 %v2006_v48 }
 0x4e7   : > { %1574 = vmatpush.msra.mxu3 %v2674_v34  ;;  %v2012_v34 = vld [vmem:[%s2512_s21 + $0xc8] sm:$0xff] }
 0x4e8   : > { %1318 = vmatmul.f32.gmra.mxu0 %v3061_v31  ;;  %1362 = vmatmul.f32.gmra.mxu1 %v2002_v46 }
 0x4ed   : > { %1230 = vmatmul.f32.gmra.mxu2 %v2008_v40 }
 0x4ee   : > { %1274 = vmatmul.f32.gmra.mxu3 %v2009_v28 }
 0x4f0   : > { %1321 = vmatmul.f32.gmra.mxu0 %v3067_v55  ;;  %1365 = vmatmul.f32.gmra.mxu1 %v2001_v35 }
 0x4f5   : > { %1233 = vmatmul.f32.gmra.mxu2 %v2011_v45 }
 0x4f6   : > { %1277 = vmatmul.f32.gmra.mxu3 %v2012_v34 }
 0x4f8   : > { %1324 = vmatmul.f32.gmra.mxu0 %v3073_v37  ;;  %1368 = vmatmul.f32.gmra.mxu1 %v2000_v43 }
 0x4fd   : > { %1236 = vmatmul.f32.gmra.mxu2 %v2014_v44 }
 0x4fe   : > { %1280 = vmatmul.f32.gmra.mxu3 %v2015_v9 }
 0x500   : > { %1327 = vmatmul.f32.gmra.mxu0 %v3079_v56  ;;  %1371 = vmatmul.f32.gmra.mxu1 %v1999_v6 }
 0x505   : > { %1239 = vmatmul.f32.gmra.mxu2 %v2017_v60 }
 0x506   : > { %1283 = vmatmul.f32.gmra.mxu3 %v2018_v1 }
 0x53c   : > { %v1304_v27 = vpop.f32.mrf.mxu0  ;;  %v1348_v49 = vpop.f32.mrf.mxu1 }
 0x53d   : > { %v1191_v5 = vpop.xlane.xlu1 %1190 }
 0x53e   : > { %v1192_v25 = vrot.slane %v1191_v5, 4 }
 0x540   : > { %v1193_v50 = vadd.f32 %v1192_v25, %v1191_v5 }
 0x542   : > { %v1194_v54 = vrot.slane %v1193_v50, 2 }
 0x544   : > { %v1195_v13 = vadd.f32 %v1194_v54, %v1193_v50 }
 0x545   : > { %v1307_v61 = vpop.f32.mrf.mxu0  ;;  %v1351_v19 = vpop.f32.mrf.mxu1 }
 0x546   : > { %v1196_v14 = vrot.slane %v1195_v13, 1 }
 0x548   : > { %v1216_v10 = vpop.f32.mrf.mxu2  ;;  %v1197_v3 = vadd.f32 %v1196_v14, %v1195_v13 }
 0x549   : > { %v1260_v0 = vpop.f32.mrf.mxu3 }
 0x54a   : > { %v1261_v16 = vadd.f32 %v1260_v0, %v1216_v10  ;;  %1901 = vpush %v1197_v3 }
 0x54c   : > { %v1305_v23 = vadd.f32 %v1304_v27, %v1261_v16 }
 0x54d   : > { %v1310_v4 = vpop.f32.mrf.mxu0  ;;  %v1354_v33 = vpop.f32.mrf.mxu1 }
 0x54e   : > { %v3084_v7 = vadd.f32 %v1348_v49, %v1305_v23 }
 0x550   : > { %v1219_v24 = vpop.f32.mrf.mxu2 }
 0x551   : > { %v1263_v59 = vpop.f32.mrf.mxu3 }
 0x552   : > { %v1264_v22 = vadd.f32 %v1263_v59, %v1219_v24  ;;  %v2019_v24 = vld [vmem:[%s2512_s21 + $0x70] sm:$0xff] }
 0x553   : > { %v2020_v59 = vld [vmem:[%s2512_s21 + $0x50] sm:$0xff] }
 0x554   : > { %v1308_v11 = vadd.f32 %v1307_v61, %v1264_v22  ;;  %v2021_v22 = vld [vmem:[%s2512_s21 + $0x30] sm:$0xff] }
 0x555   : > { %v1313_v63 = vpop.f32.mrf.mxu0  ;;  %v1357_v2 = vpop.f32.mrf.mxu1 }
 0x556   : > { %v1352_v8 = vadd.f32 %v1351_v19, %v1308_v11 }
 0x558   : > { %v1222_v42 = vpop.f32.mrf.mxu2 }
 0x559   : > { %v1266_v38 = vpop.f32.mrf.mxu3 }
 0x55a   : > { %v1267_v51 = vadd.f32 %v1266_v38, %v1222_v42 }
 0x55c   : > { %v1311_v36 = vadd.f32 %v1310_v4, %v1267_v51 }
 0x55d   : > { %v1316_v29 = vpop.f32.mrf.mxu0  ;;  %v1360_v39 = vpop.f32.mrf.mxu1 }
 0x55e   : > { %v1355_v47 = vadd.f32 %v1354_v33, %v1311_v36 }
 0x560   : > { %v1225_v17 = vpop.f32.mrf.mxu2 }
 0x561   : > { %v1269_v18 = vpop.f32.mrf.mxu3 }
 0x562   : > { %v1270_v0 = vadd.f32 %v1269_v18, %v1225_v17 }
 0x564   : > { %v1314_v23 = vadd.f32 %v1313_v63, %v1270_v0 }
 0x565   : > { %v1319_v58 = vpop.f32.mrf.mxu0  ;;  %v1363_v6 = vpop.f32.mrf.mxu1 }
 0x566   : > { %v1358_v33 = vadd.f32 %v1357_v2, %v1314_v23  ;;  %v2027_v23 = vld [vmem:[%s2527_s26 + $0x10] sm:$0xff] }
 0x568   : > { %v1228_v21 = vpop.f32.mrf.mxu2 }
 0x569   : > { %v1272_v57 = vpop.f32.mrf.mxu3 }
 0x56a   : > { %v1273_v14 = vadd.f32 %v1272_v57, %v1228_v21 }
 0x56c   : > { %v1317_v3 = vadd.f32 %v1316_v29, %v1273_v14  ;;  %v2026_v14 = vld [vmem:[%s2520_s22 + $0x8] sm:$0xff] }
 0x56d   : > { %v1322_v35 = vpop.f32.mrf.mxu0  ;;  %v1366_v46 = vpop.f32.mrf.mxu1 }
 0x56e   : > { %v1361_v4 = vadd.f32 %v1360_v39, %v1317_v3 }
 0x570   : > { %v1231_v43 = vpop.f32.mrf.mxu2 }
 0x571   : > { %v1275_v30 = vpop.f32.mrf.mxu3 }
 0x572   : > { %v1276_v54 = vadd.f32 %v1275_v30, %v1231_v43 }
 0x574   : > { %v1320_v19 = vadd.f32 %v1319_v58, %v1276_v54  ;;  %v2024_v54 = vld [vmem:[%s2527_s26 + $0x8] sm:$0xff] }
 0x575   : > { %v1325_v48 = vpop.f32.mrf.mxu0  ;;  %v1369_v40 = vpop.f32.mrf.mxu1 }
 0x576   : > { %v1364_v16 = vadd.f32 %v1363_v6, %v1320_v19 }
 0x578   : > { %v1234_v41 = vpop.f32.mrf.mxu2 }
 0x579   : > { %v1278_v20 = vpop.f32.mrf.mxu3 }
 0x57a   : > { %v1279_v25 = vadd.f32 %v1278_v20, %v1234_v41 }
 0x57b   : > { %s3114_s20 = spop %1901 }
 0x57c   : > { %v1323_v13 = vadd.f32 %v1322_v35, %v1279_v25 }
 0x57d   : > { %v1328_v34 = vpop.f32.mrf.mxu0  ;;  %v1372_v5 = vpop.f32.mrf.mxu1 }
 0x57e   : > { %v1367_v10 = vadd.f32 %v1366_v46, %v1323_v13  ;;  %v2025_v13 = vld [vmem:[%s2520_s22] sm:$0xff] }
 0x580   : > { %v1237_v28 = vpop.f32.mrf.mxu2 }
 0x581   : > { %v1281_v45 = vpop.f32.mrf.mxu3 }
 0x582   : > { %v1282_v60 = vadd.f32 %v1281_v45, %v1237_v28 }
 0x584   : > { %v1326_v49 = vadd.f32 %v1325_v48, %v1282_v60 }
 0x586   : > { %v1370_v61 = vadd.f32 %v1369_v40, %v1326_v49 }
 0x588   : > { %v1240_v44 = vpop.f32.mrf.mxu2 }
 0x589   : > { %v1284_v9 = vpop.f32.mrf.mxu3 }
 0x58a   : > { %v1285_v1 = vadd.f32 %v1284_v9, %v1240_v44 }
 0x58c   : > { %v1329_v27 = vadd.f32 %v1328_v34, %v1285_v1 }
 0x58e   : > { %v1373_v50 = vadd.f32 %v1372_v5, %v1329_v27 }
 0x590   : > { %1868 = vmatpush.xpose.msk.msrb.mxu2 %vm963_vm1, %v1373_v50  ;;  %v2023_v50 = vld [vmem:[%s2527_s26] sm:$0xff] }
 0x594   : > { %1869 = vmatpush.xpose.msk.msrb.mxu2 %vm963_vm1, %v1370_v61 }
 0x598   : > { %1870 = vmatpush.xpose.msk.msrb.mxu2 %vm963_vm1, %v1367_v10 }
 0x59c   : > { %1871 = vmatpush.xpose.msk.msrb.mxu2 %vm963_vm1, %v1364_v16 }
 0x5a0   : > { %1872 = vmatpush.xpose.msk.msrb.mxu2 %vm963_vm1, %v1361_v4 }
 0x5a4   : > { %1873 = vmatpush.xpose.msk.msrb.mxu2 %vm963_vm1, %v1358_v33  ;;  %v2028_v33 = vld [vmem:[%s2527_s26 + $0x18] sm:$0xff] }
 0x5a8   : > { %1874 = vmatpush.xpose.msk.msrb.mxu2 %vm963_vm1, %v1355_v47 }
 0x5ac   : > { %1875 = vmatpush.xpose.msk.msrb.mxu2 %vm963_vm1, %v1352_v8 }
 0x5b0   : > { %1876 = vmatpush.xpose.msk.msrb.mxu2 %vm963_vm1, %v3084_v7  ;;  %v2022_v7 = vld [vmem:[%s2512_s21 + $0x10] sm:$0xff]  ;;  %s1891_s21 = sshll.u32 %s2347_s28, 4 }
 0x5b1   : > { %s1634_s30 = scalar_lea.hbm %s3182_s6, %s1891_s21 }
 0x5b2   : > { %s1637_s26 = sshll.u32 %s1634_s30, 4  ;;  %s1638_s26 = int_to_ptr.hbm [resolvable:$true] %s1637_s26 }
 0x5b3   : > { %1877 = vmatmul.msk.f32.vlgmr.msrb.gmra.mxu2 %vm963_vm1, %v2939_v12  ;;  %v1423_v12 = vmul.f32 %v2979_v52, %v2954_v15  ;;  %s2210_s19 = sshra.s32 %s1638_s26, 4  ;;  %s2211_s19 = int_to_ptr.hbm [resolvable:$true] %s2210_s19 }
 0x5b4   : > { %1546 = vmatpush.msra.mxu2 %v3079_v56  ;;  %p2217_p3 = scmp.lt.s32.totalorder %s2211_s19, %s3182_s6 }
 0x5b6   : > { %1547 = vmatpush.msra.mxu2 %v3073_v37 }
 0x5b8   : > { %1548 = vmatpush.msra.mxu2 %v3067_v55 }
 0x5ba   : > { %1549 = vmatpush.msra.mxu2 %v3061_v31 }
 0x5bc   : > { %1550 = vmatpush.msra.mxu2 %v3051_v26 }
 0x5be   : > { %1551 = vmatpush.msra.mxu2 %v2019_v24 }
 0x5c0   : > { %1552 = vmatpush.msra.mxu2 %v2020_v59  ;;  %v2029_v59 = vld [vmem:[%s2520_s22 + $0x10] sm:$0xff] }
 0x5c2   : > { %1553 = vmatpush.msra.mxu2 %v2021_v22 }
 0x5c4   : > { %1554 = vmatpush.msra.mxu2 %v2022_v7  ;;  %v2030_v7 = vld [vmem:[%s2520_s22 + $0x18] sm:$0xff]  ;;  %s2212_s22 = scalar_lea.hbm %s2211_s19, 16 }
 0x5c5   : > { %p2213_p5 = scmp.ne.s32.totalorder %s2211_s19, %s2212_s22  ;;  %p2218_p12 = scmp.lt.s32.totalorder %s2216_s14, %s2212_s22 }
 0x5c7   : > { %p2214_p4 = pnand %p2213_p5, %p2374_p6  ;;  %p2219_p2 = por %p2218_p12, %p2217_p3 }
 0x5c9   : > { %p2215_p7 = pneg %p2214_p4 }
 0x5cb   : > { %p2220_p0 = pnand %p2219_p2, %p2215_p7 }
 0x636   : > { %v1419_v56 = vpop.f32.mrf.mxu2 }
 0x637   : > { %v1422_v11 = vmul.f32 %v1419_v56, %v1014_v32 }
 0x639   : > { %v1424_v37 = vadd.f32 %v1423_v12, %v1422_v11 }
 0x63b   : > { %1878 = vmatmul.msk.f32.vlgmr.msrb.gmra.mxu3 %vm679_vm0, %v1424_v37  ;;  %v1425_v31 = vmul.f32 %v1424_v37, %v1424_v37 }
 0x63d   : > { %v1426_v26 = vsel %vm679_vm0, %v1425_v31, 0.0 }
 0x63e   : > { %1427 = vadd.xlane.f32.xlu2 %v1426_v26 }
 0x6b1   : > { %v1428_v55 = vpop.xlane.xlu2 %1427 }
 0x6b2   : > { %v1429_v8 = vrot.slane %v1428_v55, 4 }
 0x6b4   : > { %v1430_v63 = vadd.f32 %v1429_v8, %v1428_v55 }
 0x6b6   : > { %v1431_v2 = vrot.slane %v1430_v63, 2 }
 0x6b8   : > { %v1432_v42 = vadd.f32 %v1431_v2, %v1430_v63 }
 0x6ba   : > { %v1433_v38 = vrot.slane %v1432_v42, 1 }
 0x6bc   : > { %v1434_v51 = vadd.f32 %v1433_v38, %v1432_v42 }
 0x6be   : > { %1903 = vpush %v1434_v51  ;;  %v1457_v36 = vpop.f32.mrf.mxu3 }
 0x6bf   : > { %v1460_v32 = vmul.f32 %v1457_v36, %v1424_v37 }
 0x6c1   : > { %v1461_v47 = vsel %vm679_vm0, %v1460_v32, 0.0 }
 0x6c2   : > { %1462 = vadd.xlane.f32.xlu2 %v1461_v47 }
 0x6ef   : > { %s1904_s24 = spop %1903 }
 0x6f0   : > { %v1436_v6 = vstv %s1904_s24 }
 0x6f1   : > { %v1473_v30 = vmul.f32 %v1436_v6, %v2954_v15 }
 0x735   : > { %v1463_v29 = vpop.xlane.xlu2 %1462 }
 0x736   : > { %v1464_v17 = vrot.slane %v1463_v29, 4 }
 0x738   : > { %v1465_v18 = vadd.f32 %v1464_v17, %v1463_v29 }
 0x73a   : > { %v1466_v39 = vrot.slane %v1465_v18, 2 }
 0x73c   : > { %v1467_v21 = vadd.f32 %v1466_v39, %v1465_v18 }
 0x73e   : > { %v1468_v57 = vrot.slane %v1467_v21, 1 }
 0x740   : > { %v1469_v58 = vadd.f32 %v1468_v57, %v1467_v21 }
 0x742   : > { %1905 = vpush %v1469_v58 }
 0x773   : > { %s1906_s29 = spop %1905 }
 0x774   : > { %v1471_v43 = vstv %s1906_s29 }
 0x775   : > { %v1472_v35 = vmul.f32 %v1471_v43, %v2968_v62 }
 0x777   : > { %v1474_v46 = vadd.f32 %v1473_v30, %v1472_v35 }
 0x779   : > { %v1475_v41 = vmax.f32 %v1474_v46, 1e-08 }
 0x77b   : > { %1997 = vrcp.f32 %v1475_v41  ;;  %v1487_v28 = vand.u32 2147483648, %v1475_v41  ;;  %v1485_v34 = vand.u32 2147483647, %v1475_v41  ;;  %vm1481_vm7 = vweird.f32 %v1475_v41 }
 0x77d   : > { %v1488_v9 = vor.u32 1.1754944e-38, %v1487_v28  ;;  %vm1486_vm9 = vcmp.eq.f32.partialorder %v1485_v34, 8.507059e+37 }
 0x781   : > { %v1998_v20 = vpop.eup %1997 }
 0x782   : > { %v1477_v48 = vmul.f32 %v1998_v20, %v1475_v41  ;;  %vm1482_vm6 = vweird.f32 %v1998_v20 }
 0x783   : > { %vm1483_vm8 = vmor %vm1481_vm7, %vm1482_vm6 }
 0x784   : > { %v1478_v40 = vsub.f32 1.0, %v1477_v48 }
 0x786   : > { %v1479_v45 = vmul.f32 %v1998_v20, %v1478_v40 }
 0x788   : > { %v1480_v44 = vadd.f32 %v1998_v20, %v1479_v45 }
 0x78a   : > { %v1484_v15 = vsel %vm1483_vm8, %v1998_v20, %v1480_v44 }
 0x78b   : > { %v1489_v62 = vsel %vm1486_vm9, %v1488_v9, %v1484_v15 }
 0x78c   : > { %v1490_v60 = vmul.f32 %v1489_v62, %v1436_v6 }
 0x78e   : > { %v1491_v1 = vmul.f32 %v1490_v60, %v1087_v53 }
 0x790   : > { %v1492_v5 = vmul.f32 %v1491_v1, %v1424_v37 }
 0x792   : > { %v1493_v27 = vsub.f32 %v2979_v52, %v1492_v5 }
 0x794   : > { %1880 = vmatmul.msk.f32.vlgmr.msra.gmra.mxu0 %vm679_vm0, %v1493_v27  ;;  %1881 = vmatmul.msk.f32.vlgmr.msra.gmra.mxu1 %vm679_vm0, %v1493_v27  ;;  %1879 = vst.msk [vmem:[%s2985_s9 + $0x8] sm:$0xff] %vm679_vm0, %v1493_v27 }
 0x795   : > { %1882 = vmatmul.msk.f32.vlgmr.msra.gmra.mxu2 %vm679_vm0, %v1493_v27  ;;  %1883 = vmatmul.msk.f32.vlgmr.msra.gmra.mxu3 %vm679_vm0, %v1493_v27 }
 0x811   : > { %v1516_v25 = vpop.f32.mrf.mxu0  ;;  %v1536_v49 = vpop.f32.mrf.mxu1 }
 0x812   : > { %v1579_v53 = vmul.f32 %v2023_v50, %v1516_v25  ;;  %v1580_v52 = vmul.f32 %v2024_v54, %v1536_v49 }
 0x814   : > { %v1583_v61 = vsub.f32 %v1579_v53, %v2025_v13  ;;  %v1584_v19 = vsub.f32 %v1580_v52, %v2026_v14 }
 0x816   : > { %v1587_v3 = vmul.f32 %v1583_v61, %v1583_v61  ;;  %v1588_v16 = vmul.f32 %v1584_v19, %v1584_v19 }
 0x818   : > { %v1556_v10 = vpop.f32.mrf.mxu2  ;;  %v1576_v0 = vpop.f32.mrf.mxu3  ;;  %v1591_v11 = vadd.f32 %v1588_v16, %v1587_v3 }
 0x819   : > { %v1581_v4 = vmul.f32 %v2027_v23, %v1556_v10  ;;  %v1582_v24 = vmul.f32 %v2028_v33, %v1576_v0 }
 0x81b   : > { %v1585_v22 = vsub.f32 %v1581_v4, %v2029_v59  ;;  %v1586_v56 = vsub.f32 %v1582_v24, %v2030_v7 }
 0x81d   : > { %v1589_v12 = vmul.f32 %v1585_v22, %v1585_v22  ;;  %v1590_v37 = vmul.f32 %v1586_v56, %v1586_v56 }
 0x81f   : > { %v1592_v31 = vadd.f32 %v1591_v11, %v1589_v12 }
 0x821   : > { %v1593_v26 = vadd.f32 %v1592_v31, %v1590_v37 }
 0x823   : > { %1594 = vadd.xlane.f32.xlu0 %v1593_v26 }
 0x824   : > { %2223 = shalt.err (!%p2220_p0)
}
 0x825   : > { %s2284_s2 = smov 128   ;;  %s2285_s15 = smov 8   ;;  %v1603_v36 = vlaneseq  ;;  %v1610_v47 = vstv %s3114_s20  ;;  %v1606_v29 = vstv %s2964_s5 }
 0x826   : > { %1925 = dma.vmem_to_hbm [thread:$0]  (%p2374_p6), %s1636_s13, 256, %s1638_s26, %s1619_s0, %s2284_s2, %s2284_s2, %s2285_s15  }
 0x827   : > { %p450_p13 = scmp.lt.s32.totalorder %s2347_s28, 1  ;;  %v1604_v32 = vshrl.u32 %v1603_v36, 7 }
 0x829   : > { %vm1609_vm10 = vcmp.eq.s32.totalorder %v1604_v32, 1  ;;  %s3375_s28 = smov (!%p450_p13, %s2347_s28), 1  ;;  %vm1605_vm11 = vcmp.eq.s32.totalorder %v1604_v32, 0  ;;  %vm1613_vm12 = vcmp.eq.s32.totalorder %v1604_v32, 2 }
 0x82a   : > { %v1611_v17 = vsel %vm1609_vm10, %v1610_v47, 0.0  ;;  %s1846_s12 = sshll.u32 %s3375_s28, 2  ;;  %v1607_v18 = vsel %vm1605_vm11, %v1606_v29, 0.0 }
 0x82b   : > { %v1612_v39 = vadd.f32 %v1611_v17, %v1607_v18  ;;  %s453_s29 = scalar_lea.vmem %s3183_s7, %s1846_s12 }
 0x896   : > { %v1595_v55 = vpop.xlane.xlu0 %1594 }
 0x897   : > { %v1596_v8 = vrot.slane %v1595_v55, 4 }
 0x899   : > { %v1597_v63 = vadd.f32 %v1596_v8, %v1595_v55 }
 0x89b   : > { %v1598_v2 = vrot.slane %v1597_v63, 2 }
 0x89d   : > { %v1599_v42 = vadd.f32 %v1598_v2, %v1597_v63 }
 0x89f   : > { %v1600_v38 = vrot.slane %v1599_v42, 1 }
 0x8a1   : > { %v1601_v51 = vadd.f32 %v1600_v38, %v1599_v42 }
 0x8a3   : > { %1907 = vpush %v1601_v51 }
 0x8d4   : > { %s1908_s10 = spop %1907 }
 0x8d5   : > { %v1614_v21 = vstv %s1908_s10 }
 0x8d6   : > { %v1615_v57 = vsel %vm1613_vm12, %v1614_v21, 0.0 }
 0x8d7   : > { %v1616_v58 = vadd.f32 %v1615_v57, %v1612_v39 }
 0x8d9   : > { %1617 = vst [vmem:[%s453_s29] sm:$0x7] %v1616_v58 }
 0x8da PF: > { %s3366_s21 = sld [smem:[#allocation20_spill]]  ;;  %p3368_p6 = scmp.ge.s32.totalorder %s2278_s27, 2 }
 0x8dc   : > { %p1948_p9 = pnand %p3368_p6, %p2380_p10 }
 0x8de   : > { %p1949_p1 = pneg %p1948_p9 }
 0x8e0   : > { %s1655_s17 = sand.u32 1, %s3366_s21  }
 0x8e1   : > { %s1656_s28 = scalar_lea.sflag [#allocation4], %s1655_s17 }
 0x8e2   : > { %2261 = dma.done.wait (%p1949_p1), %s1656_s28, 256  }
 0x8e3   : > { %2263 = vsyncadd (%p1949_p1), %s1656_s28, 4294967040  ;;  %s3369_s27 = sld [smem:[#allocation22_spill]]  ;;  %s3372_s24 = smov %s2270_s25 }
 0x8e4   : > { %s3370_s5 = sld [smem:[#allocation21_spill]] }
 0x8e5   : > { %s3371_s26 = sld [smem:[#allocation23_spill]] }
 0x8e9   : > { %p28_p11 = scmp.ge.s32.totalorder %s3369_s27, 4  }
 0x8ea   : > { %s3373_s25 = smov %s3370_s5 }
 0x8eb   :  { %30 = sbr.rel (!%p28_p11) target bundleno = 14 (0xe), region = 148 }
 0x8f0   :  { %1669 = vsyncpa [#allocation3], 1 }
 0x8f1   :  { %1671 = vsyncpa [#allocation3 + $0x1], 1 }
 0x8f2   :  { %1672 = vsyncpa [#allocation8], 1 }
 0x8f3   :  { %1674 = vsyncpa [#allocation8 + $0x1], 1 }
 0x8f4   :  { %1675 = vsyncpa [#allocation11], 1 }
 0x8f5   :  { %1677 = vsyncpa [#allocation11 + $0x1], 1 }
 0x8f6   :  { %1678 = vsyncpa [#allocation4], 1 }
 0x8f7   :  { %1680 = vsyncpa [#allocation4 + $0x1], 1 }
 0x8f8   :  { %1681 = vsyncpa [#allocation5], 1 }
 0x8f9   :  { %1683 = vsyncpa [#allocation5 + $0x1], 1 }

</bundles_post_ra>
